<compile_context>
chip_gen: v7x
topology: tpu7x:2x2x1
jax: 0.10.0
libtpu: 0.0.40
codegen_flags: <defaults>
</compile_context>

<pallas_src>
import functools

import jax
import jax.numpy as jnp
import numpy as np
from jax.experimental import pallas as pl
from jax.experimental.pallas import tpu as pltpu


def _normalize(x, eps=1e-5):
    """One-pass LayerNorm normalization (affine folded into downstream weights)."""
    mu = jnp.mean(x, axis=-1, keepdims=True)
    ms = jnp.mean(x * x, axis=-1, keepdims=True)
    var = jnp.maximum(ms - mu * mu, 0.0)
    return (x - mu) * jax.lax.rsqrt(var + eps)


def _slot_attention_kernel(
    x_ref,      # (Bt*N, C)   per-pixel features (compute dtype)
    s_ref,      # (Bt*S, D)   slot inits (compute dtype)
    dvec_ref,   # (6, D) f32  [q_bias, b_r, b_z, b_in, b_hn, b2]
    kvb_ref,    # (1, 2D) f32 fused k|v bias (folded ln_in beta)
    b1_ref,     # (1, H) f32  MLP hidden bias (folded ln_m beta)
    wkv_ref,    # (C, 2D)     fused k|v projection (ln_in gamma folded)
    wq_ref,     # (D, D)      q projection (ln_q gamma + attn_scale folded)
    wih_ref,    # (D, 3D)     GRU input->gates
    whh_ref,    # (D, 3D)     GRU hidden->gates
    w1_ref,     # (D, H)      MLP layer 1 (ln_m gamma folded)
    w2_ref,     # (H, D)      MLP layer 2
    out_ref,    # (Bt*S, D) f32
    *, num_iterations, eps, num_inputs, num_slots, slot_size, batch_tile,
    compute_dtype,
):
    N, S, D, Bt = num_inputs, num_slots, slot_size, batch_tile
    f32 = jnp.float32
    cdt = compute_dtype

    # ---- parameter loads, hoisted (executed once per grid step) -------------
    dvec = dvec_ref[...]
    q_bias = dvec[0:1, :]
    b_r = dvec[1:2, :]
    b_z = dvec[2:3, :]
    b_ni = dvec[3:4, :]
    b_nh = dvec[4:5, :]
    b2 = dvec[5:6, :]
    kv_bias = kvb_ref[...]
    b1 = b1_ref[...]
    wkv, wq = wkv_ref[...], wq_ref[...]
    wih, whh = wih_ref[...], whh_ref[...]
    w1, w2 = w1_ref[...], w2_ref[...]

    # Block-diagonal batch mask (compares only, no integer division), built
    # once per grid step and hoisted out of the iteration loop.
    if Bt > 1:
        r = jax.lax.broadcasted_iota(jnp.int32, (Bt * S, Bt * N), 0)
        c = jax.lax.broadcasted_iota(jnp.int32, (Bt * S, Bt * N), 1)
        mask = None
        for b in range(Bt):
            blk = (((r >= b * S) & (r < (b + 1) * S))
                   & ((c >= b * N) & (c < (b + 1) * N)))
            mask = blk if mask is None else (mask | blk)
    else:
        mask = None
    neg_inf = jnp.float32(-1e30)

    # norm_inputs + fused k|v projection: one matmul over all Bt*N tokens.
    xh = _normalize(x_ref[...].astype(f32))
    kv = jnp.dot(xh.astype(cdt), wkv, preferred_element_type=f32) + kv_bias
    k_t = kv[:, :D].T.astype(cdt)             # (D, Bt*N), loop-invariant
    v = kv[:, D:].astype(cdt)                 # (Bt*N, D)

    def body(_, slots):
        slots_prev = slots
        slots_c = slots.astype(cdt)

        # project_q (ln_q affine + attn_scale folded into wq / q_bias).
        q = jnp.dot(_normalize(slots).astype(cdt), wq,
                    preferred_element_type=f32) + q_bias          # (Bt*S, D)

        # Block-diagonal cross-attention over all Bt batch blocks at once.
        logits = jnp.dot(q.astype(cdt), k_t, preferred_element_type=f32)
        if mask is not None:
            logits = jnp.where(mask, logits, neg_inf)
        m = jnp.max(logits, axis=0, keepdims=True)
        e = jnp.exp(logits - m)
        attn = e / jnp.sum(e, axis=0, keepdims=True)               # softmax over slots
        attn = attn + eps
        if mask is not None:
            attn = jnp.where(mask, attn, 0.0)
        attn = attn / jnp.sum(attn, axis=1, keepdims=True)         # renorm over tokens
        updates = jnp.dot(attn.astype(cdt), v,
                          preferred_element_type=f32)              # (Bt*S, D)

        # GRUCell (PyTorch gate order r, z, n): two fused (D, 3D) matmuls.
        gi = jnp.dot(updates.astype(cdt), wih, preferred_element_type=f32)
        gh = jnp.dot(slots_c, whh, preferred_element_type=f32)
        r_g = jax.nn.sigmoid(gi[:, 0:D] + gh[:, 0:D] + b_r)
        z_g = jax.nn.sigmoid(gi[:, D:2 * D] + gh[:, D:2 * D] + b_z)
        n_g = jnp.tanh(gi[:, 2 * D:3 * D] + b_ni + r_g * (gh[:, 2 * D:3 * D] + b_nh))
        slots_new = (1.0 - z_g) * n_g + z_g * slots_prev

        # Residual MLP (ln_m affine folded into w1 / b1).
        y = jnp.dot(_normalize(slots_new).astype(cdt), w1,
                    preferred_element_type=f32) + b1
        y = jnp.maximum(y, 0.0)
        y = jnp.dot(y.astype(cdt), w2, preferred_element_type=f32) + b2
        return slots_new + y

    slots0 = s_ref[...].astype(f32)
    slots_out = jax.lax.fori_loop(0, num_iterations, body, slots0,
                                  unroll=num_iterations <= 4)
    out_ref[...] = slots_out.astype(out_ref.dtype)


def _estimate_vmem_bytes(Bt, N, C, S, D, H, act_bytes, param_bytes):
    """Rough per-grid-step VMEM footprint (double-buffered blocks + residents)."""
    blocks = 2 * (Bt * N * C * act_bytes          # x block
                  + Bt * S * D * act_bytes        # slots block
                  + Bt * S * D * 4)               # out block
    params = 2 * param_bytes
    inter = (Bt * N * 2 * D * (4 + act_bytes)     # fused k|v (f32 acc + cdt copy)
             + 3 * (Bt * S) * (Bt * N) * 4        # logits / attn / mask
             + Bt * S * (12 * D + 2 * H) * 4)     # q, gates, slots, MLP temps
    return int(1.25 * (blocks + params + inter))


def _pick_batch_tile(B, N, S, C, D, H, act_bytes, param_bytes, budget_bytes):
    """Largest divisor of B whose blocks are (8,128)-legal and whose estimated
    VMEM footprint fits the budget; falls back to the smallest legal divisor."""
    def legal(d):
        # non-full second-minor block dims must be sublane (8) aligned
        return d == B or ((d * N) % 8 == 0 and (d * S) % 8 == 0)
    divisors = [d for d in range(B, 0, -1) if B % d == 0 and legal(d)]
    for d in divisors:
        if _estimate_vmem_bytes(d, N, C, S, D, H, act_bytes,
                                param_bytes) <= budget_bytes:
            return d
    return divisors[-1]


def pack_params(params, *, slot_size, attn_scale, compute_dtype):
    """Fold LayerNorm affines + attn_scale into weights; pack biases."""
    D = slot_size
    f32 = jnp.float32
    cdt = compute_dtype

    g_in, bt_in = params["ln_in_g"].astype(f32), params["ln_in_b"].astype(f32)
    g_q, bt_q = params["ln_q_g"].astype(f32), params["ln_q_b"].astype(f32)
    g_m, bt_m = params["ln_m_g"].astype(f32), params["ln_m_b"].astype(f32)

    wkv = jnp.concatenate([params["wk"], params["wv"]], axis=1).astype(f32)
    kv_bias = bt_in @ wkv                        # (1, 2D)
    wkv = g_in.reshape(-1, 1) * wkv              # fold ln_in gamma

    wq = params["wq"].astype(f32)
    q_bias = (bt_q @ wq) * attn_scale            # (1, D)
    wq = g_q.reshape(-1, 1) * wq * attn_scale    # fold ln_q gamma + attn scale

    w1 = params["w1"].astype(f32)
    b1 = params["b1"].astype(f32) + bt_m @ w1    # (1, H)
    w1 = g_m.reshape(-1, 1) * w1                 # fold ln_m gamma

    b_ih, b_hh = params["b_ih"].astype(f32), params["b_hh"].astype(f32)
    dvec = jnp.concatenate([
        q_bias,
        b_ih[:, 0:D] + b_hh[:, 0:D],             # r-gate bias (combined)
        b_ih[:, D:2 * D] + b_hh[:, D:2 * D],     # z-gate bias (combined)
        b_ih[:, 2 * D:3 * D],                    # n-gate input bias
        b_hh[:, 2 * D:3 * D],                    # n-gate hidden bias
        params["b2"].astype(f32),
    ], axis=0)                                    # (6, D)

    return [dvec, kv_bias, b1,
            wkv.astype(cdt), wq.astype(cdt),
            params["w_ih"].astype(cdt), params["w_hh"].astype(cdt),
            w1.astype(cdt), params["w2"].astype(cdt)]


def slot_attention_pallas(inputs, slots, params, *, num_iterations, eps=1e-6,
                          batch_tile=None, compute_dtype=jnp.bfloat16,
                          vmem_budget_frac=0.70):
    B, N, C = inputs.shape
    _, S, D = slots.shape
    H = params["w1"].shape[1]

    packed = pack_params(params, slot_size=D, attn_scale=D ** (-0.5),
                         compute_dtype=compute_dtype)
    param_bytes = sum(int(np.prod(p.shape)) * np.dtype(p.dtype).itemsize
                      for p in packed)
    act_bytes = np.dtype(compute_dtype).itemsize

    # Per-generation VMEM budgeting (v5e/v6e: 128 MiB physical, v7x: 64 MiB).
    try:
        vmem_cap = int(getattr(pltpu.get_tpu_info(), "vmem_capacity_bytes",
                               64 * 1024 * 1024))
    except Exception:
        vmem_cap = 64 * 1024 * 1024
    budget = int(vmem_budget_frac * vmem_cap)
    vmem_limit = int(min(max(32 * 1024 * 1024, int(0.85 * vmem_cap)),
                         vmem_cap, 100 * 1024 * 1024))

    if batch_tile is None:
        # TODO(synk): on v7x pass batch_tile <= B // 2 so the "parallel" grid
        # axis has >= 2 steps for the two TensorCores.
        batch_tile = _pick_batch_tile(B, N, S, C, D, H, act_bytes,
                                      param_bytes, budget)
    assert B % batch_tile == 0, "batch_tile must divide batch size"
    Bt = batch_tile
    num_tiles = B // Bt

    # Activations cross HBM in the compute dtype (no wrapper f32 up-cast).
    x2d = inputs.reshape(B * N, C).astype(compute_dtype)
    s2d = slots.reshape(B * S, D).astype(compute_dtype)

    kernel = functools.partial(
        _slot_attention_kernel,
        num_iterations=num_iterations, eps=eps,
        num_inputs=N, num_slots=S, slot_size=D, batch_tile=Bt,
        compute_dtype=compute_dtype)

    in_specs = [
        pl.BlockSpec((Bt * N, C), lambda b: (b, 0)),
        pl.BlockSpec((Bt * S, D), lambda b: (b, 0)),
    ]
    in_specs += [pl.BlockSpec(p.shape, lambda b: (0, 0)) for p in packed]

    # Advisory cost estimate for XLA scheduling around the custom call.
    flops = (4 * B * N * C * D
             + num_iterations * (2 * B * S * D * D
                                 + 4 * B * S * Bt * N * D
                                 + 12 * B * S * D * D
                                 + 4 * B * S * D * H))
    transcendentals = num_iterations * B * S * (Bt * N + 3 * D)
    bytes_accessed = ((B * N * C + B * S * D) * act_bytes
                      + B * S * D * 4 + num_tiles * param_bytes)

    out2d = pl.pallas_call(
        kernel,
        out_shape=jax.ShapeDtypeStruct((B * S, D), jnp.float32),
        grid=(num_tiles,),
        in_specs=in_specs,
        out_specs=pl.BlockSpec((Bt * S, D), lambda b: (b, 0)),
        compiler_params=pltpu.CompilerParams(
            dimension_semantics=("parallel",),
            vmem_limit_bytes=vmem_limit),
        cost_estimate=pl.CostEstimate(
            flops=int(flops),
            transcendentals=int(transcendentals),
            bytes_accessed=int(bytes_accessed)),
    )(x2d, s2d, *packed)

    return out2d.reshape(B, S, D)


# ----------------------------- pure-JAX reference -----------------------------
def _layernorm_ref(x, g, b, eps=1e-5):
    mu = jnp.mean(x, axis=-1, keepdims=True)
    var = jnp.mean((x - mu) ** 2, axis=-1, keepdims=True)
    return (x - mu) * jax.lax.rsqrt(var + eps) * g + b


def slot_attention_ref(inputs, slots, params, *, num_iterations, eps=1e-6):
    """Pure-JAX f32 reference mirroring the PyTorch forward."""
    D = slots.shape[-1]
    scale = D ** (-0.5)
    with jax.default_matmul_precision("highest"):
        xn = _layernorm_ref(inputs, params["ln_in_g"], params["ln_in_b"])
        k = xn @ params["wk"]
        v = xn @ params["wv"]
        for _ in range(num_iterations):
            slots_prev = slots
            q = _layernorm_ref(slots, params["ln_q_g"], params["ln_q_b"]) @ params["wq"]
            logits = scale * jnp.einsum("bnc,bmc->bnm", k, q)
            attn = jax.nn.softmax(logits, axis=-1)
            attn = attn + eps
            attn = attn / jnp.sum(attn, axis=1, keepdims=True)
            updates = jnp.einsum("bnm,bnc->bmc", attn, v)
            gi = updates @ params["w_ih"] + params["b_ih"]
            gh = slots_prev @ params["w_hh"] + params["b_hh"]
            r = jax.nn.sigmoid(gi[..., 0 * D:1 * D] + gh[..., 0 * D:1 * D])
            z = jax.nn.sigmoid(gi[..., 1 * D:2 * D] + gh[..., 1 * D:2 * D])
            n = jnp.tanh(gi[..., 2 * D:3 * D] + r * gh[..., 2 * D:3 * D])
            slots = (1.0 - z) * n + z * slots_prev
            y = _layernorm_ref(slots, params["ln_m_g"], params["ln_m_b"])
            y = jnp.maximum(y @ params["w1"] + params["b1"], 0.0)
            y = y @ params["w2"] + params["b2"]
            slots = slots + y
    return slots


def make_params(key, in_features, slot_size, mlp_hidden_size):
    C, D, H = in_features, slot_size, mlp_hidden_size
    ks = jax.random.split(key, 17)
    s = 0.1

    def rnd(i, shape):
        return s * jax.random.normal(ks[i], shape, jnp.float32)

    return {
        # LayerNorm on inputs (non-trivial affine to exercise weight folding)
        "ln_in_g": 1.0 + rnd(0, (1, C)), "ln_in_b": rnd(1, (1, C)),
        # k / v projections (stored pre-transposed: [in, out])
        "wk": rnd(2, (C, D)), "wv": rnd(3, (C, D)),
        # q projection: LayerNorm + Linear(no bias)
        "ln_q_g": 1.0 + rnd(4, (1, D)), "ln_q_b": rnd(5, (1, D)),
        "wq": rnd(6, (D, D)),
        # GRUCell (PyTorch gate order r, z, n), pre-transposed to [D, 3D]
        "w_ih": rnd(7, (D, 3 * D)), "w_hh": rnd(8, (D, 3 * D)),
        "b_ih": rnd(9, (1, 3 * D)), "b_hh": rnd(10, (1, 3 * D)),
        # residual MLP
        "ln_m_g": 1.0 + rnd(11, (1, D)), "ln_m_b": rnd(12, (1, D)),
        "w1": rnd(13, (D, H)), "b1": rnd(14, (1, H)),
        "w2": rnd(15, (H, D)), "b2": rnd(16, (1, D)),
    }


if __name__ == "__main__":
    # Small config consistent with the module's constructor.
    B, N = 2, 16                 # batch, number of flattened per-pixel tokens
    in_features = 8
    num_slots, slot_size = 4, 32
    mlp_hidden_size = 64
    num_iterations = 3

    key = jax.random.PRNGKey(0)
    k_in, k_sl, k_par = jax.random.split(key, 3)
    inputs = jax.random.normal(k_in, (B, N, in_features), jnp.float32)
    slots = jax.random.normal(k_sl, (B, num_slots, slot_size), jnp.float32)
    params = make_params(k_par, in_features, slot_size, mlp_hidden_size)

    ref = slot_attention_ref(inputs, slots, params,
                             num_iterations=num_iterations)

    # Exact-semantics check: f32 compute path.
    out_f32 = slot_attention_pallas(inputs, slots, params,
                                    num_iterations=num_iterations,
                                    compute_dtype=jnp.float32)
    out_f32 = jax.block_until_ready(out_f32)
    np.testing.assert_allclose(np.asarray(out_f32), np.asarray(ref),
                               rtol=1e-4, atol=1e-4)

    # Production bf16 MXU path: loose sanity check against the f32 reference.
    out_bf16 = slot_attention_pallas(inputs, slots, params,
                                     num_iterations=num_iterations,
                                     compute_dtype=jnp.bfloat16)
    out_bf16 = jax.block_until_ready(out_bf16)
    np.testing.assert_allclose(np.asarray(out_bf16), np.asarray(ref),
                               rtol=5e-2, atol=5e-2)

    print("KERNEL_OK")
</pallas_src>

<mosaic_0001>
module attributes {stable_mosaic.version = 11 : i64} {
  func.func @_slot_attention_kernel(%arg0: i32, %arg1: memref<32x8xf32, #tpu.memory_space<vmem>>, %arg2: memref<8x32xf32, #tpu.memory_space<vmem>>, %arg3: memref<6x32xf32, #tpu.memory_space<vmem>>, %arg4: memref<1x64xf32, #tpu.memory_space<vmem>>, %arg5: memref<1x64xf32, #tpu.memory_space<vmem>>, %arg6: memref<8x64xf32, #tpu.memory_space<vmem>>, %arg7: memref<32x32xf32, #tpu.memory_space<vmem>>, %arg8: memref<32x96xf32, #tpu.memory_space<vmem>>, %arg9: memref<32x96xf32, #tpu.memory_space<vmem>>, %arg10: memref<32x64xf32, #tpu.memory_space<vmem>>, %arg11: memref<64x32xf32, #tpu.memory_space<vmem>>, %arg12: memref<8x32xf32, #tpu.memory_space<vmem>>) attributes {dimension_semantics = [#tpu.dimension_semantics<parallel>], iteration_bounds = array<i64: 1>, scalar_prefetch = 0 : i64, scratch_operands = 0 : i64, tpu.core_type = #tpu.core_type<tc>, window_params = [{transform_indices = @transform_0, window_bounds = array<i64: 32, 8>}, {transform_indices = @transform_1, window_bounds = array<i64: 8, 32>}, {pipeline_mode = #tpu.pipeline_mode<synchronous>, transform_indices = @transform_2, window_bounds = array<i64: 6, 32>}, {pipeline_mode = #tpu.pipeline_mode<synchronous>, transform_indices = @transform_3, window_bounds = array<i64: 1, 64>}, {pipeline_mode = #tpu.pipeline_mode<synchronous>, transform_indices = @transform_4, window_bounds = array<i64: 1, 64>}, {pipeline_mode = #tpu.pipeline_mode<synchronous>, transform_indices = @transform_5, window_bounds = array<i64: 8, 64>}, {pipeline_mode = #tpu.pipeline_mode<synchronous>, transform_indices = @transform_6, window_bounds = array<i64: 32, 32>}, {pipeline_mode = #tpu.pipeline_mode<synchronous>, transform_indices = @transform_7, window_bounds = array<i64: 32, 96>}, {pipeline_mode = #tpu.pipeline_mode<synchronous>, transform_indices = @transform_8, window_bounds = array<i64: 32, 96>}, {pipeline_mode = #tpu.pipeline_mode<synchronous>, transform_indices = @transform_9, window_bounds = array<i64: 32, 64>}, {pipeline_mode = #tpu.pipeline_mode<synchronous>, transform_indices = @transform_10, window_bounds = array<i64: 64, 32>}, {transform_indices = @transform_11, window_bounds = array<i64: 8, 32>}]} {
    %c0 = arith.constant 0 : index
    %c0_0 = arith.constant 0 : index
    %0 = vector.load %arg3[%c0, %c0_0] : memref<6x32xf32, #tpu.memory_space<vmem>>, vector<6x32xf32>
    %1 = vector.extract_strided_slice %0 {offsets = [0, 0], sizes = [1, 32], strides = [1, 1]} : vector<6x32xf32> to vector<1x32xf32>
    %2 = vector.extract_strided_slice %0 {offsets = [1, 0], sizes = [1, 32], strides = [1, 1]} : vector<6x32xf32> to vector<1x32xf32>
    %3 = vector.extract_strided_slice %0 {offsets = [2, 0], sizes = [1, 32], strides = [1, 1]} : vector<6x32xf32> to vector<1x32xf32>
    %4 = vector.extract_strided_slice %0 {offsets = [3, 0], sizes = [1, 32], strides = [1, 1]} : vector<6x32xf32> to vector<1x32xf32>
    %5 = vector.extract_strided_slice %0 {offsets = [4, 0], sizes = [1, 32], strides = [1, 1]} : vector<6x32xf32> to vector<1x32xf32>
    %6 = vector.extract_strided_slice %0 {offsets = [5, 0], sizes = [1, 32], strides = [1, 1]} : vector<6x32xf32> to vector<1x32xf32>
    %c0_1 = arith.constant 0 : index
    %c0_2 = arith.constant 0 : index
    %7 = vector.load %arg4[%c0_1, %c0_2] : memref<1x64xf32, #tpu.memory_space<vmem>>, vector<1x64xf32>
    %c0_3 = arith.constant 0 : index
    %c0_4 = arith.constant 0 : index
    %8 = vector.load %arg5[%c0_3, %c0_4] : memref<1x64xf32, #tpu.memory_space<vmem>>, vector<1x64xf32>
    %c0_5 = arith.constant 0 : index
    %c0_6 = arith.constant 0 : index
    %9 = vector.load %arg6[%c0_5, %c0_6] : memref<8x64xf32, #tpu.memory_space<vmem>>, vector<8x64xf32>
    %c0_7 = arith.constant 0 : index
    %c0_8 = arith.constant 0 : index
    %10 = vector.load %arg7[%c0_7, %c0_8] : memref<32x32xf32, #tpu.memory_space<vmem>>, vector<32x32xf32>
    %c0_9 = arith.constant 0 : index
    %c0_10 = arith.constant 0 : index
    %11 = vector.load %arg8[%c0_9, %c0_10] : memref<32x96xf32, #tpu.memory_space<vmem>>, vector<32x96xf32>
    %c0_11 = arith.constant 0 : index
    %c0_12 = arith.constant 0 : index
    %12 = vector.load %arg9[%c0_11, %c0_12] : memref<32x96xf32, #tpu.memory_space<vmem>>, vector<32x96xf32>
    %c0_13 = arith.constant 0 : index
    %c0_14 = arith.constant 0 : index
    %13 = vector.load %arg10[%c0_13, %c0_14] : memref<32x64xf32, #tpu.memory_space<vmem>>, vector<32x64xf32>
    %c0_15 = arith.constant 0 : index
    %c0_16 = arith.constant 0 : index
    %14 = vector.load %arg11[%c0_15, %c0_16] : memref<64x32xf32, #tpu.memory_space<vmem>>, vector<64x32xf32>
    %15 = tpu.iota {dimensions = array<i32: 0>} : vector<8x32xi32>
    %16 = tpu.iota {dimensions = array<i32: 1>} : vector<8x32xi32>
    %c0_i32 = arith.constant 0 : i32
    %17 = vector.broadcast %c0_i32 : i32 to vector<8x32xi32>
    %18 = arith.cmpi sge, %15, %17 : vector<8x32xi32>
    %c4_i32 = arith.constant 4 : i32
    %19 = vector.broadcast %c4_i32 : i32 to vector<8x32xi32>
    %20 = arith.cmpi slt, %15, %19 : vector<8x32xi32>
    %21 = arith.andi %18, %20 : vector<8x32xi1>
    %c0_i32_17 = arith.constant 0 : i32
    %22 = vector.broadcast %c0_i32_17 : i32 to vector<8x32xi32>
    %23 = arith.cmpi sge, %16, %22 : vector<8x32xi32>
    %c16_i32 = arith.constant 16 : i32
    %24 = vector.broadcast %c16_i32 : i32 to vector<8x32xi32>
    %25 = arith.cmpi slt, %16, %24 : vector<8x32xi32>
    %26 = arith.andi %23, %25 : vector<8x32xi1>
    %27 = arith.andi %21, %26 : vector<8x32xi1>
    %c4_i32_18 = arith.constant 4 : i32
    %28 = vector.broadcast %c4_i32_18 : i32 to vector<8x32xi32>
    %29 = arith.cmpi sge, %15, %28 : vector<8x32xi32>
    %c8_i32 = arith.constant 8 : i32
    %30 = vector.broadcast %c8_i32 : i32 to vector<8x32xi32>
    %31 = arith.cmpi slt, %15, %30 : vector<8x32xi32>
    %32 = arith.andi %29, %31 : vector<8x32xi1>
    %c16_i32_19 = arith.constant 16 : i32
    %33 = vector.broadcast %c16_i32_19 : i32 to vector<8x32xi32>
    %34 = arith.cmpi sge, %16, %33 : vector<8x32xi32>
    %c32_i32 = arith.constant 32 : i32
    %35 = vector.broadcast %c32_i32 : i32 to vector<8x32xi32>
    %36 = arith.cmpi slt, %16, %35 : vector<8x32xi32>
    %37 = arith.andi %34, %36 : vector<8x32xi1>
    %38 = arith.andi %32, %37 : vector<8x32xi1>
    %39 = arith.ori %27, %38 : vector<8x32xi1>
    %c0_20 = arith.constant 0 : index
    %c0_21 = arith.constant 0 : index
    %40 = vector.load %arg1[%c0_20, %c0_21] : memref<32x8xf32, #tpu.memory_space<vmem>>, vector<32x8xf32>
    %cst = arith.constant dense<0.000000e+00> : vector<32xf32>
    %41 = vector.multi_reduction <add>, %40, %cst [1] : vector<32x8xf32> to vector<32xf32>
    %42 = vector.shape_cast %41 : vector<32xf32> to vector<32x1xf32>
    %cst_22 = arith.constant 8.000000e+00 : f32
    %43 = vector.broadcast %cst_22 : f32 to vector<32x1xf32>
    %44 = arith.divf %42, %43 : vector<32x1xf32>
    %45 = arith.mulf %40, %40 : vector<32x8xf32>
    %cst_23 = arith.constant dense<0.000000e+00> : vector<32xf32>
    %46 = vector.multi_reduction <add>, %45, %cst_23 [1] : vector<32x8xf32> to vector<32xf32>
    %47 = vector.shape_cast %46 : vector<32xf32> to vector<32x1xf32>
    %cst_24 = arith.constant 8.000000e+00 : f32
    %48 = vector.broadcast %cst_24 : f32 to vector<32x1xf32>
    %49 = arith.divf %47, %48 : vector<32x1xf32>
    %50 = arith.mulf %44, %44 : vector<32x1xf32>
    %51 = arith.subf %49, %50 : vector<32x1xf32>
    %cst_25 = arith.constant 0.000000e+00 : f32
    %52 = vector.broadcast %cst_25 : f32 to vector<32x1xf32>
    %53 = arith.maximumf %51, %52 : vector<32x1xf32>
    %54 = vector.broadcast %44 : vector<32x1xf32> to vector<32x8xf32>
    %55 = arith.subf %40, %54 : vector<32x8xf32>
    %cst_26 = arith.constant 9.99999974E-6 : f32
    %56 = vector.broadcast %cst_26 : f32 to vector<32x1xf32>
    %57 = arith.addf %53, %56 : vector<32x1xf32>
    %58 = math.rsqrt %57 : vector<32x1xf32>
    %59 = vector.broadcast %58 : vector<32x1xf32> to vector<32x8xf32>
    %60 = arith.mulf %55, %59 : vector<32x8xf32>
    %cst_27 = arith.constant dense<0.000000e+00> : vector<32x64xf32>
    %61 = tpu.matmul %60, %9, %cst_27 {dimension_numbers = #tpu.dot_dimension_numbers<[1], [0], [0], [1], [0, 0, 1, 1], [], []>} : vector<32x8xf32>, vector<8x64xf32>, vector<32x64xf32> -> vector<32x64xf32>
    %62 = vector.broadcast %7 : vector<1x64xf32> to vector<32x64xf32>
    %63 = arith.addf %61, %62 : vector<32x64xf32>
    %64 = vector.extract_strided_slice %63 {offsets = [0, 0], sizes = [32, 32], strides = [1, 1]} : vector<32x64xf32> to vector<32x32xf32>
    %65 = tpu.transpose %64, [1, 0] : vector<32x32xf32> -> vector<32x32xf32>
    %66 = vector.extract_strided_slice %63 {offsets = [0, 32], sizes = [32, 32], strides = [1, 1]} : vector<32x64xf32> to vector<32x32xf32>
    %c0_28 = arith.constant 0 : index
    %c0_29 = arith.constant 0 : index
    %67 = vector.load %arg2[%c0_28, %c0_29] : memref<8x32xf32, #tpu.memory_space<vmem>>, vector<8x32xf32>
    %cst_30 = arith.constant -1.000000e+30 : f32
    %c0_i32_31 = arith.constant 0 : i32
    %cst_32 = arith.constant dense<0.000000e+00> : vector<8xf32>
    %68 = vector.multi_reduction <add>, %67, %cst_32 [1] : vector<8x32xf32> to vector<8xf32>
    %69 = vector.shape_cast %68 : vector<8xf32> to vector<8x1xf32>
    %cst_33 = arith.constant 3.200000e+01 : f32
    %70 = vector.broadcast %cst_33 : f32 to vector<8x1xf32>
    %71 = arith.divf %69, %70 : vector<8x1xf32>
    %72 = arith.mulf %67, %67 : vector<8x32xf32>
    %cst_34 = arith.constant dense<0.000000e+00> : vector<8xf32>
    %73 = vector.multi_reduction <add>, %72, %cst_34 [1] : vector<8x32xf32> to vector<8xf32>
    %74 = vector.shape_cast %73 : vector<8xf32> to vector<8x1xf32>
    %cst_35 = arith.constant 3.200000e+01 : f32
    %75 = vector.broadcast %cst_35 : f32 to vector<8x1xf32>
    %76 = arith.divf %74, %75 : vector<8x1xf32>
    %77 = arith.mulf %71, %71 : vector<8x1xf32>
    %78 = arith.subf %76, %77 : vector<8x1xf32>
    %cst_36 = arith.constant 0.000000e+00 : f32
    %79 = vector.broadcast %cst_36 : f32 to vector<8x1xf32>
    %80 = arith.maximumf %78, %79 : vector<8x1xf32>
    %81 = vector.broadcast %71 : vector<8x1xf32> to vector<8x32xf32>
    %82 = arith.subf %67, %81 : vector<8x32xf32>
    %cst_37 = arith.constant 9.99999974E-6 : f32
    %83 = vector.broadcast %cst_37 : f32 to vector<8x1xf32>
    %84 = arith.addf %80, %83 : vector<8x1xf32>
    %85 = math.rsqrt %84 : vector<8x1xf32>
    %86 = vector.broadcast %85 : vector<8x1xf32> to vector<8x32xf32>
    %87 = arith.mulf %82, %86 : vector<8x32xf32>
    %cst_38 = arith.constant dense<0.000000e+00> : vector<8x32xf32>
    %88 = tpu.matmul %87, %10, %cst_38 {dimension_numbers = #tpu.dot_dimension_numbers<[1], [0], [0], [1], [0, 0, 1, 1], [], []>} : vector<8x32xf32>, vector<32x32xf32>, vector<8x32xf32> -> vector<8x32xf32>
    %89 = vector.broadcast %1 : vector<1x32xf32> to vector<8x32xf32>
    %90 = arith.addf %88, %89 : vector<8x32xf32>
    %cst_39 = arith.constant dense<0.000000e+00> : vector<8x32xf32>
    %91 = tpu.matmul %90, %65, %cst_39 {dimension_numbers = #tpu.dot_dimension_numbers<[1], [0], [0], [1], [0, 0, 1, 1], [], []>} : vector<8x32xf32>, vector<32x32xf32>, vector<8x32xf32> -> vector<8x32xf32>
    %92 = vector.broadcast %cst_30 : f32 to vector<8x32xf32>
    %93 = arith.select %39, %91, %92 : vector<8x32xi1>, vector<8x32xf32>
    %cst_40 = arith.constant dense<0xFF800000> : vector<32xf32>
    %94 = vector.multi_reduction <maximumf>, %93, %cst_40 [0] : vector<8x32xf32> to vector<32xf32>
    %95 = vector.shape_cast %94 : vector<32xf32> to vector<1x32xf32>
    %96 = vector.broadcast %95 : vector<1x32xf32> to vector<8x32xf32>
    %97 = arith.subf %93, %96 : vector<8x32xf32>
    %98 = math.exp %97 : vector<8x32xf32>
    %cst_41 = arith.constant dense<0.000000e+00> : vector<32xf32>
    %99 = vector.multi_reduction <add>, %98, %cst_41 [0] : vector<8x32xf32> to vector<32xf32>
    %100 = vector.shape_cast %99 : vector<32xf32> to vector<1x32xf32>
    %101 = vector.broadcast %100 : vector<1x32xf32> to vector<8x32xf32>
    %102 = arith.divf %98, %101 : vector<8x32xf32>
    %cst_42 = arith.constant 9.99999997E-7 : f32
    %103 = vector.broadcast %cst_42 : f32 to vector<8x32xf32>
    %104 = arith.addf %102, %103 : vector<8x32xf32>
    %cst_43 = arith.constant 0.000000e+00 : f32
    %105 = vector.broadcast %cst_43 : f32 to vector<8x32xf32>
    %106 = arith.select %39, %104, %105 : vector<8x32xi1>, vector<8x32xf32>
    %cst_44 = arith.constant dense<0.000000e+00> : vector<8xf32>
    %107 = vector.multi_reduction <add>, %106, %cst_44 [1] : vector<8x32xf32> to vector<8xf32>
    %108 = vector.shape_cast %107 : vector<8xf32> to vector<8x1xf32>
    %109 = vector.broadcast %108 : vector<8x1xf32> to vector<8x32xf32>
    %110 = arith.divf %106, %109 : vector<8x32xf32>
    %cst_45 = arith.constant dense<0.000000e+00> : vector<8x32xf32>
    %111 = tpu.matmul %110, %66, %cst_45 {dimension_numbers = #tpu.dot_dimension_numbers<[1], [0], [0], [1], [0, 0, 1, 1], [], []>} : vector<8x32xf32>, vector<32x32xf32>, vector<8x32xf32> -> vector<8x32xf32>
    %cst_46 = arith.constant dense<0.000000e+00> : vector<8x96xf32>
    %112 = tpu.matmul %111, %11, %cst_46 {dimension_numbers = #tpu.dot_dimension_numbers<[1], [0], [0], [1], [0, 0, 1, 1], [], []>} : vector<8x32xf32>, vector<32x96xf32>, vector<8x96xf32> -> vector<8x96xf32>
    %cst_47 = arith.constant dense<0.000000e+00> : vector<8x96xf32>
    %113 = tpu.matmul %67, %12, %cst_47 {dimension_numbers = #tpu.dot_dimension_numbers<[1], [0], [0], [1], [0, 0, 1, 1], [], []>} : vector<8x32xf32>, vector<32x96xf32>, vector<8x96xf32> -> vector<8x96xf32>
    %114 = vector.extract_strided_slice %112 {offsets = [0, 0], sizes = [8, 32], strides = [1, 1]} : vector<8x96xf32> to vector<8x32xf32>
    %115 = vector.extract_strided_slice %113 {offsets = [0, 0], sizes = [8, 32], strides = [1, 1]} : vector<8x96xf32> to vector<8x32xf32>
    %116 = arith.addf %114, %115 : vector<8x32xf32>
    %117 = vector.broadcast %2 : vector<1x32xf32> to vector<8x32xf32>
    %118 = arith.addf %116, %117 : vector<8x32xf32>
    %119 = arith.negf %118 : vector<8x32xf32>
    %120 = math.exp %119 : vector<8x32xf32>
    %cst_48 = arith.constant 1.000000e+00 : f32
    %121 = vector.broadcast %cst_48 : f32 to vector<8x32xf32>
    %122 = arith.addf %121, %120 : vector<8x32xf32>
    %123 = arith.divf %121, %122 : vector<8x32xf32>
    %124 = vector.extract_strided_slice %112 {offsets = [0, 32], sizes = [8, 32], strides = [1, 1]} : vector<8x96xf32> to vector<8x32xf32>
    %125 = vector.extract_strided_slice %113 {offsets = [0, 32], sizes = [8, 32], strides = [1, 1]} : vector<8x96xf32> to vector<8x32xf32>
    %126 = arith.addf %124, %125 : vector<8x32xf32>
    %127 = vector.broadcast %3 : vector<1x32xf32> to vector<8x32xf32>
    %128 = arith.addf %126, %127 : vector<8x32xf32>
    %129 = arith.negf %128 : vector<8x32xf32>
    %130 = math.exp %129 : vector<8x32xf32>
    %cst_49 = arith.constant 1.000000e+00 : f32
    %131 = vector.broadcast %cst_49 : f32 to vector<8x32xf32>
    %132 = arith.addf %131, %130 : vector<8x32xf32>
    %133 = arith.divf %131, %132 : vector<8x32xf32>
    %134 = vector.extract_strided_slice %112 {offsets = [0, 64], sizes = [8, 32], strides = [1, 1]} : vector<8x96xf32> to vector<8x32xf32>
    %135 = vector.broadcast %4 : vector<1x32xf32> to vector<8x32xf32>
    %136 = arith.addf %134, %135 : vector<8x32xf32>
    %137 = vector.extract_strided_slice %113 {offsets = [0, 64], sizes = [8, 32], strides = [1, 1]} : vector<8x96xf32> to vector<8x32xf32>
    %138 = vector.broadcast %5 : vector<1x32xf32> to vector<8x32xf32>
    %139 = arith.addf %137, %138 : vector<8x32xf32>
    %140 = arith.mulf %123, %139 : vector<8x32xf32>
    %141 = arith.addf %136, %140 : vector<8x32xf32>
    %142 = math.tanh %141 : vector<8x32xf32>
    %cst_50 = arith.constant 1.000000e+00 : f32
    %143 = vector.broadcast %cst_50 : f32 to vector<8x32xf32>
    %144 = arith.subf %143, %133 : vector<8x32xf32>
    %145 = arith.mulf %144, %142 : vector<8x32xf32>
    %146 = arith.mulf %133, %67 : vector<8x32xf32>
    %147 = arith.addf %145, %146 : vector<8x32xf32>
    %cst_51 = arith.constant dense<0.000000e+00> : vector<8xf32>
    %148 = vector.multi_reduction <add>, %147, %cst_51 [1] : vector<8x32xf32> to vector<8xf32>
    %149 = vector.shape_cast %148 : vector<8xf32> to vector<8x1xf32>
    %cst_52 = arith.constant 3.200000e+01 : f32
    %150 = vector.broadcast %cst_52 : f32 to vector<8x1xf32>
    %151 = arith.divf %149, %150 : vector<8x1xf32>
    %152 = arith.mulf %147, %147 : vector<8x32xf32>
    %cst_53 = arith.constant dense<0.000000e+00> : vector<8xf32>
    %153 = vector.multi_reduction <add>, %152, %cst_53 [1] : vector<8x32xf32> to vector<8xf32>
    %154 = vector.shape_cast %153 : vector<8xf32> to vector<8x1xf32>
    %cst_54 = arith.constant 3.200000e+01 : f32
    %155 = vector.broadcast %cst_54 : f32 to vector<8x1xf32>
    %156 = arith.divf %154, %155 : vector<8x1xf32>
    %157 = arith.mulf %151, %151 : vector<8x1xf32>
    %158 = arith.subf %156, %157 : vector<8x1xf32>
    %cst_55 = arith.constant 0.000000e+00 : f32
    %159 = vector.broadcast %cst_55 : f32 to vector<8x1xf32>
    %160 = arith.maximumf %158, %159 : vector<8x1xf32>
    %161 = vector.broadcast %151 : vector<8x1xf32> to vector<8x32xf32>
    %162 = arith.subf %147, %161 : vector<8x32xf32>
    %cst_56 = arith.constant 9.99999974E-6 : f32
    %163 = vector.broadcast %cst_56 : f32 to vector<8x1xf32>
    %164 = arith.addf %160, %163 : vector<8x1xf32>
    %165 = math.rsqrt %164 : vector<8x1xf32>
    %166 = vector.broadcast %165 : vector<8x1xf32> to vector<8x32xf32>
    %167 = arith.mulf %162, %166 : vector<8x32xf32>
    %cst_57 = arith.constant dense<0.000000e+00> : vector<8x64xf32>
    %168 = tpu.matmul %167, %13, %cst_57 {dimension_numbers = #tpu.dot_dimension_numbers<[1], [0], [0], [1], [0, 0, 1, 1], [], []>} : vector<8x32xf32>, vector<32x64xf32>, vector<8x64xf32> -> vector<8x64xf32>
    %169 = vector.broadcast %8 : vector<1x64xf32> to vector<8x64xf32>
    %170 = arith.addf %168, %169 : vector<8x64xf32>
    %cst_58 = arith.constant 0.000000e+00 : f32
    %171 = vector.broadcast %cst_58 : f32 to vector<8x64xf32>
    %172 = arith.maximumf %170, %171 : vector<8x64xf32>
    %cst_59 = arith.constant dense<0.000000e+00> : vector<8x32xf32>
    %173 = tpu.matmul %172, %14, %cst_59 {dimension_numbers = #tpu.dot_dimension_numbers<[1], [0], [0], [1], [0, 0, 1, 1], [], []>} : vector<8x64xf32>, vector<64x32xf32>, vector<8x32xf32> -> vector<8x32xf32>
    %174 = vector.broadcast %6 : vector<1x32xf32> to vector<8x32xf32>
    %175 = arith.addf %173, %174 : vector<8x32xf32>
    %176 = arith.addf %147, %175 : vector<8x32xf32>
    %c1_i32 = arith.constant 1 : i32
    %cst_60 = arith.constant dense<0.000000e+00> : vector<8xf32>
    %177 = vector.multi_reduction <add>, %176, %cst_60 [1] : vector<8x32xf32> to vector<8xf32>
    %178 = vector.shape_cast %177 : vector<8xf32> to vector<8x1xf32>
    %cst_61 = arith.constant 3.200000e+01 : f32
    %179 = vector.broadcast %cst_61 : f32 to vector<8x1xf32>
    %180 = arith.divf %178, %179 : vector<8x1xf32>
    %181 = arith.mulf %176, %176 : vector<8x32xf32>
    %cst_62 = arith.constant dense<0.000000e+00> : vector<8xf32>
    %182 = vector.multi_reduction <add>, %181, %cst_62 [1] : vector<8x32xf32> to vector<8xf32>
    %183 = vector.shape_cast %182 : vector<8xf32> to vector<8x1xf32>
    %cst_63 = arith.constant 3.200000e+01 : f32
    %184 = vector.broadcast %cst_63 : f32 to vector<8x1xf32>
    %185 = arith.divf %183, %184 : vector<8x1xf32>
    %186 = arith.mulf %180, %180 : vector<8x1xf32>
    %187 = arith.subf %185, %186 : vector<8x1xf32>
    %cst_64 = arith.constant 0.000000e+00 : f32
    %188 = vector.broadcast %cst_64 : f32 to vector<8x1xf32>
    %189 = arith.maximumf %187, %188 : vector<8x1xf32>
    %190 = vector.broadcast %180 : vector<8x1xf32> to vector<8x32xf32>
    %191 = arith.subf %176, %190 : vector<8x32xf32>
    %cst_65 = arith.constant 9.99999974E-6 : f32
    %192 = vector.broadcast %cst_65 : f32 to vector<8x1xf32>
    %193 = arith.addf %189, %192 : vector<8x1xf32>
    %194 = math.rsqrt %193 : vector<8x1xf32>
    %195 = vector.broadcast %194 : vector<8x1xf32> to vector<8x32xf32>
    %196 = arith.mulf %191, %195 : vector<8x32xf32>
    %cst_66 = arith.constant dense<0.000000e+00> : vector<8x32xf32>
    %197 = tpu.matmul %196, %10, %cst_66 {dimension_numbers = #tpu.dot_dimension_numbers<[1], [0], [0], [1], [0, 0, 1, 1], [], []>} : vector<8x32xf32>, vector<32x32xf32>, vector<8x32xf32> -> vector<8x32xf32>
    %198 = vector.broadcast %1 : vector<1x32xf32> to vector<8x32xf32>
    %199 = arith.addf %197, %198 : vector<8x32xf32>
    %cst_67 = arith.constant dense<0.000000e+00> : vector<8x32xf32>
    %200 = tpu.matmul %199, %65, %cst_67 {dimension_numbers = #tpu.dot_dimension_numbers<[1], [0], [0], [1], [0, 0, 1, 1], [], []>} : vector<8x32xf32>, vector<32x32xf32>, vector<8x32xf32> -> vector<8x32xf32>
    %201 = vector.broadcast %cst_30 : f32 to vector<8x32xf32>
    %202 = arith.select %39, %200, %201 : vector<8x32xi1>, vector<8x32xf32>
    %cst_68 = arith.constant dense<0xFF800000> : vector<32xf32>
    %203 = vector.multi_reduction <maximumf>, %202, %cst_68 [0] : vector<8x32xf32> to vector<32xf32>
    %204 = vector.shape_cast %203 : vector<32xf32> to vector<1x32xf32>
    %205 = vector.broadcast %204 : vector<1x32xf32> to vector<8x32xf32>
    %206 = arith.subf %202, %205 : vector<8x32xf32>
    %207 = math.exp %206 : vector<8x32xf32>
    %cst_69 = arith.constant dense<0.000000e+00> : vector<32xf32>
    %208 = vector.multi_reduction <add>, %207, %cst_69 [0] : vector<8x32xf32> to vector<32xf32>
    %209 = vector.shape_cast %208 : vector<32xf32> to vector<1x32xf32>
    %210 = vector.broadcast %209 : vector<1x32xf32> to vector<8x32xf32>
    %211 = arith.divf %207, %210 : vector<8x32xf32>
    %cst_70 = arith.constant 9.99999997E-7 : f32
    %212 = vector.broadcast %cst_70 : f32 to vector<8x32xf32>
    %213 = arith.addf %211, %212 : vector<8x32xf32>
    %cst_71 = arith.constant 0.000000e+00 : f32
    %214 = vector.broadcast %cst_71 : f32 to vector<8x32xf32>
    %215 = arith.select %39, %213, %214 : vector<8x32xi1>, vector<8x32xf32>
    %cst_72 = arith.constant dense<0.000000e+00> : vector<8xf32>
    %216 = vector.multi_reduction <add>, %215, %cst_72 [1] : vector<8x32xf32> to vector<8xf32>
    %217 = vector.shape_cast %216 : vector<8xf32> to vector<8x1xf32>
    %218 = vector.broadcast %217 : vector<8x1xf32> to vector<8x32xf32>
    %219 = arith.divf %215, %218 : vector<8x32xf32>
    %cst_73 = arith.constant dense<0.000000e+00> : vector<8x32xf32>
    %220 = tpu.matmul %219, %66, %cst_73 {dimension_numbers = #tpu.dot_dimension_numbers<[1], [0], [0], [1], [0, 0, 1, 1], [], []>} : vector<8x32xf32>, vector<32x32xf32>, vector<8x32xf32> -> vector<8x32xf32>
    %cst_74 = arith.constant dense<0.000000e+00> : vector<8x96xf32>
    %221 = tpu.matmul %220, %11, %cst_74 {dimension_numbers = #tpu.dot_dimension_numbers<[1], [0], [0], [1], [0, 0, 1, 1], [], []>} : vector<8x32xf32>, vector<32x96xf32>, vector<8x96xf32> -> vector<8x96xf32>
    %cst_75 = arith.constant dense<0.000000e+00> : vector<8x96xf32>
    %222 = tpu.matmul %176, %12, %cst_75 {dimension_numbers = #tpu.dot_dimension_numbers<[1], [0], [0], [1], [0, 0, 1, 1], [], []>} : vector<8x32xf32>, vector<32x96xf32>, vector<8x96xf32> -> vector<8x96xf32>
    %223 = vector.extract_strided_slice %221 {offsets = [0, 0], sizes = [8, 32], strides = [1, 1]} : vector<8x96xf32> to vector<8x32xf32>
    %224 = vector.extract_strided_slice %222 {offsets = [0, 0], sizes = [8, 32], strides = [1, 1]} : vector<8x96xf32> to vector<8x32xf32>
    %225 = arith.addf %223, %224 : vector<8x32xf32>
    %226 = vector.broadcast %2 : vector<1x32xf32> to vector<8x32xf32>
    %227 = arith.addf %225, %226 : vector<8x32xf32>
    %228 = arith.negf %227 : vector<8x32xf32>
    %229 = math.exp %228 : vector<8x32xf32>
    %cst_76 = arith.constant 1.000000e+00 : f32
    %230 = vector.broadcast %cst_76 : f32 to vector<8x32xf32>
    %231 = arith.addf %230, %229 : vector<8x32xf32>
    %232 = arith.divf %230, %231 : vector<8x32xf32>
    %233 = vector.extract_strided_slice %221 {offsets = [0, 32], sizes = [8, 32], strides = [1, 1]} : vector<8x96xf32> to vector<8x32xf32>
    %234 = vector.extract_strided_slice %222 {offsets = [0, 32], sizes = [8, 32], strides = [1, 1]} : vector<8x96xf32> to vector<8x32xf32>
    %235 = arith.addf %233, %234 : vector<8x32xf32>
    %236 = vector.broadcast %3 : vector<1x32xf32> to vector<8x32xf32>
    %237 = arith.addf %235, %236 : vector<8x32xf32>
    %238 = arith.negf %237 : vector<8x32xf32>
    %239 = math.exp %238 : vector<8x32xf32>
    %cst_77 = arith.constant 1.000000e+00 : f32
    %240 = vector.broadcast %cst_77 : f32 to vector<8x32xf32>
    %241 = arith.addf %240, %239 : vector<8x32xf32>
    %242 = arith.divf %240, %241 : vector<8x32xf32>
    %243 = vector.extract_strided_slice %221 {offsets = [0, 64], sizes = [8, 32], strides = [1, 1]} : vector<8x96xf32> to vector<8x32xf32>
    %244 = vector.broadcast %4 : vector<1x32xf32> to vector<8x32xf32>
    %245 = arith.addf %243, %244 : vector<8x32xf32>
    %246 = vector.extract_strided_slice %222 {offsets = [0, 64], sizes = [8, 32], strides = [1, 1]} : vector<8x96xf32> to vector<8x32xf32>
    %247 = vector.broadcast %5 : vector<1x32xf32> to vector<8x32xf32>
    %248 = arith.addf %246, %247 : vector<8x32xf32>
    %249 = arith.mulf %232, %248 : vector<8x32xf32>
    %250 = arith.addf %245, %249 : vector<8x32xf32>
    %251 = math.tanh %250 : vector<8x32xf32>
    %cst_78 = arith.constant 1.000000e+00 : f32
    %252 = vector.broadcast %cst_78 : f32 to vector<8x32xf32>
    %253 = arith.subf %252, %242 : vector<8x32xf32>
    %254 = arith.mulf %253, %251 : vector<8x32xf32>
    %255 = arith.mulf %242, %176 : vector<8x32xf32>
    %256 = arith.addf %254, %255 : vector<8x32xf32>
    %cst_79 = arith.constant dense<0.000000e+00> : vector<8xf32>
    %257 = vector.multi_reduction <add>, %256, %cst_79 [1] : vector<8x32xf32> to vector<8xf32>
    %258 = vector.shape_cast %257 : vector<8xf32> to vector<8x1xf32>
    %cst_80 = arith.constant 3.200000e+01 : f32
    %259 = vector.broadcast %cst_80 : f32 to vector<8x1xf32>
    %260 = arith.divf %258, %259 : vector<8x1xf32>
    %261 = arith.mulf %256, %256 : vector<8x32xf32>
    %cst_81 = arith.constant dense<0.000000e+00> : vector<8xf32>
    %262 = vector.multi_reduction <add>, %261, %cst_81 [1] : vector<8x32xf32> to vector<8xf32>
    %263 = vector.shape_cast %262 : vector<8xf32> to vector<8x1xf32>
    %cst_82 = arith.constant 3.200000e+01 : f32
    %264 = vector.broadcast %cst_82 : f32 to vector<8x1xf32>
    %265 = arith.divf %263, %264 : vector<8x1xf32>
    %266 = arith.mulf %260, %260 : vector<8x1xf32>
    %267 = arith.subf %265, %266 : vector<8x1xf32>
    %cst_83 = arith.constant 0.000000e+00 : f32
    %268 = vector.broadcast %cst_83 : f32 to vector<8x1xf32>
    %269 = arith.maximumf %267, %268 : vector<8x1xf32>
    %270 = vector.broadcast %260 : vector<8x1xf32> to vector<8x32xf32>
    %271 = arith.subf %256, %270 : vector<8x32xf32>
    %cst_84 = arith.constant 9.99999974E-6 : f32
    %272 = vector.broadcast %cst_84 : f32 to vector<8x1xf32>
    %273 = arith.addf %269, %272 : vector<8x1xf32>
    %274 = math.rsqrt %273 : vector<8x1xf32>
    %275 = vector.broadcast %274 : vector<8x1xf32> to vector<8x32xf32>
    %276 = arith.mulf %271, %275 : vector<8x32xf32>
    %cst_85 = arith.constant dense<0.000000e+00> : vector<8x64xf32>
    %277 = tpu.matmul %276, %13, %cst_85 {dimension_numbers = #tpu.dot_dimension_numbers<[1], [0], [0], [1], [0, 0, 1, 1], [], []>} : vector<8x32xf32>, vector<32x64xf32>, vector<8x64xf32> -> vector<8x64xf32>
    %278 = vector.broadcast %8 : vector<1x64xf32> to vector<8x64xf32>
    %279 = arith.addf %277, %278 : vector<8x64xf32>
    %cst_86 = arith.constant 0.000000e+00 : f32
    %280 = vector.broadcast %cst_86 : f32 to vector<8x64xf32>
    %281 = arith.maximumf %279, %280 : vector<8x64xf32>
    %cst_87 = arith.constant dense<0.000000e+00> : vector<8x32xf32>
    %282 = tpu.matmul %281, %14, %cst_87 {dimension_numbers = #tpu.dot_dimension_numbers<[1], [0], [0], [1], [0, 0, 1, 1], [], []>} : vector<8x64xf32>, vector<64x32xf32>, vector<8x32xf32> -> vector<8x32xf32>
    %283 = vector.broadcast %6 : vector<1x32xf32> to vector<8x32xf32>
    %284 = arith.addf %282, %283 : vector<8x32xf32>
    %285 = arith.addf %256, %284 : vector<8x32xf32>
    %c2_i32 = arith.constant 2 : i32
    %cst_88 = arith.constant dense<0.000000e+00> : vector<8xf32>
    %286 = vector.multi_reduction <add>, %285, %cst_88 [1] : vector<8x32xf32> to vector<8xf32>
    %287 = vector.shape_cast %286 : vector<8xf32> to vector<8x1xf32>
    %cst_89 = arith.constant 3.200000e+01 : f32
    %288 = vector.broadcast %cst_89 : f32 to vector<8x1xf32>
    %289 = arith.divf %287, %288 : vector<8x1xf32>
    %290 = arith.mulf %285, %285 : vector<8x32xf32>
    %cst_90 = arith.constant dense<0.000000e+00> : vector<8xf32>
    %291 = vector.multi_reduction <add>, %290, %cst_90 [1] : vector<8x32xf32> to vector<8xf32>
    %292 = vector.shape_cast %291 : vector<8xf32> to vector<8x1xf32>
    %cst_91 = arith.constant 3.200000e+01 : f32
    %293 = vector.broadcast %cst_91 : f32 to vector<8x1xf32>
    %294 = arith.divf %292, %293 : vector<8x1xf32>
    %295 = arith.mulf %289, %289 : vector<8x1xf32>
    %296 = arith.subf %294, %295 : vector<8x1xf32>
    %cst_92 = arith.constant 0.000000e+00 : f32
    %297 = vector.broadcast %cst_92 : f32 to vector<8x1xf32>
    %298 = arith.maximumf %296, %297 : vector<8x1xf32>
    %299 = vector.broadcast %289 : vector<8x1xf32> to vector<8x32xf32>
    %300 = arith.subf %285, %299 : vector<8x32xf32>
    %cst_93 = arith.constant 9.99999974E-6 : f32
    %301 = vector.broadcast %cst_93 : f32 to vector<8x1xf32>
    %302 = arith.addf %298, %301 : vector<8x1xf32>
    %303 = math.rsqrt %302 : vector<8x1xf32>
    %304 = vector.broadcast %303 : vector<8x1xf32> to vector<8x32xf32>
    %305 = arith.mulf %300, %304 : vector<8x32xf32>
    %cst_94 = arith.constant dense<0.000000e+00> : vector<8x32xf32>
    %306 = tpu.matmul %305, %10, %cst_94 {dimension_numbers = #tpu.dot_dimension_numbers<[1], [0], [0], [1], [0, 0, 1, 1], [], []>} : vector<8x32xf32>, vector<32x32xf32>, vector<8x32xf32> -> vector<8x32xf32>
    %307 = vector.broadcast %1 : vector<1x32xf32> to vector<8x32xf32>
    %308 = arith.addf %306, %307 : vector<8x32xf32>
    %cst_95 = arith.constant dense<0.000000e+00> : vector<8x32xf32>
    %309 = tpu.matmul %308, %65, %cst_95 {dimension_numbers = #tpu.dot_dimension_numbers<[1], [0], [0], [1], [0, 0, 1, 1], [], []>} : vector<8x32xf32>, vector<32x32xf32>, vector<8x32xf32> -> vector<8x32xf32>
    %310 = vector.broadcast %cst_30 : f32 to vector<8x32xf32>
    %311 = arith.select %39, %309, %310 : vector<8x32xi1>, vector<8x32xf32>
    %cst_96 = arith.constant dense<0xFF800000> : vector<32xf32>
    %312 = vector.multi_reduction <maximumf>, %311, %cst_96 [0] : vector<8x32xf32> to vector<32xf32>
    %313 = vector.shape_cast %312 : vector<32xf32> to vector<1x32xf32>
    %314 = vector.broadcast %313 : vector<1x32xf32> to vector<8x32xf32>
    %315 = arith.subf %311, %314 : vector<8x32xf32>
    %316 = math.exp %315 : vector<8x32xf32>
    %cst_97 = arith.constant dense<0.000000e+00> : vector<32xf32>
    %317 = vector.multi_reduction <add>, %316, %cst_97 [0] : vector<8x32xf32> to vector<32xf32>
    %318 = vector.shape_cast %317 : vector<32xf32> to vector<1x32xf32>
    %319 = vector.broadcast %318 : vector<1x32xf32> to vector<8x32xf32>
    %320 = arith.divf %316, %319 : vector<8x32xf32>
    %cst_98 = arith.constant 9.99999997E-7 : f32
    %321 = vector.broadcast %cst_98 : f32 to vector<8x32xf32>
    %322 = arith.addf %320, %321 : vector<8x32xf32>
    %cst_99 = arith.constant 0.000000e+00 : f32
    %323 = vector.broadcast %cst_99 : f32 to vector<8x32xf32>
    %324 = arith.select %39, %322, %323 : vector<8x32xi1>, vector<8x32xf32>
    %cst_100 = arith.constant dense<0.000000e+00> : vector<8xf32>
    %325 = vector.multi_reduction <add>, %324, %cst_100 [1] : vector<8x32xf32> to vector<8xf32>
    %326 = vector.shape_cast %325 : vector<8xf32> to vector<8x1xf32>
    %327 = vector.broadcast %326 : vector<8x1xf32> to vector<8x32xf32>
    %328 = arith.divf %324, %327 : vector<8x32xf32>
    %cst_101 = arith.constant dense<0.000000e+00> : vector<8x32xf32>
    %329 = tpu.matmul %328, %66, %cst_101 {dimension_numbers = #tpu.dot_dimension_numbers<[1], [0], [0], [1], [0, 0, 1, 1], [], []>} : vector<8x32xf32>, vector<32x32xf32>, vector<8x32xf32> -> vector<8x32xf32>
    %cst_102 = arith.constant dense<0.000000e+00> : vector<8x96xf32>
    %330 = tpu.matmul %329, %11, %cst_102 {dimension_numbers = #tpu.dot_dimension_numbers<[1], [0], [0], [1], [0, 0, 1, 1], [], []>} : vector<8x32xf32>, vector<32x96xf32>, vector<8x96xf32> -> vector<8x96xf32>
    %cst_103 = arith.constant dense<0.000000e+00> : vector<8x96xf32>
    %331 = tpu.matmul %285, %12, %cst_103 {dimension_numbers = #tpu.dot_dimension_numbers<[1], [0], [0], [1], [0, 0, 1, 1], [], []>} : vector<8x32xf32>, vector<32x96xf32>, vector<8x96xf32> -> vector<8x96xf32>
    %332 = vector.extract_strided_slice %330 {offsets = [0, 0], sizes = [8, 32], strides = [1, 1]} : vector<8x96xf32> to vector<8x32xf32>
    %333 = vector.extract_strided_slice %331 {offsets = [0, 0], sizes = [8, 32], strides = [1, 1]} : vector<8x96xf32> to vector<8x32xf32>
    %334 = arith.addf %332, %333 : vector<8x32xf32>
    %335 = vector.broadcast %2 : vector<1x32xf32> to vector<8x32xf32>
    %336 = arith.addf %334, %335 : vector<8x32xf32>
    %337 = arith.negf %336 : vector<8x32xf32>
    %338 = math.exp %337 : vector<8x32xf32>
    %cst_104 = arith.constant 1.000000e+00 : f32
    %339 = vector.broadcast %cst_104 : f32 to vector<8x32xf32>
    %340 = arith.addf %339, %338 : vector<8x32xf32>
    %341 = arith.divf %339, %340 : vector<8x32xf32>
    %342 = vector.extract_strided_slice %330 {offsets = [0, 32], sizes = [8, 32], strides = [1, 1]} : vector<8x96xf32> to vector<8x32xf32>
    %343 = vector.extract_strided_slice %331 {offsets = [0, 32], sizes = [8, 32], strides = [1, 1]} : vector<8x96xf32> to vector<8x32xf32>
    %344 = arith.addf %342, %343 : vector<8x32xf32>
    %345 = vector.broadcast %3 : vector<1x32xf32> to vector<8x32xf32>
    %346 = arith.addf %344, %345 : vector<8x32xf32>
    %347 = arith.negf %346 : vector<8x32xf32>
    %348 = math.exp %347 : vector<8x32xf32>
    %cst_105 = arith.constant 1.000000e+00 : f32
    %349 = vector.broadcast %cst_105 : f32 to vector<8x32xf32>
    %350 = arith.addf %349, %348 : vector<8x32xf32>
    %351 = arith.divf %349, %350 : vector<8x32xf32>
    %352 = vector.extract_strided_slice %330 {offsets = [0, 64], sizes = [8, 32], strides = [1, 1]} : vector<8x96xf32> to vector<8x32xf32>
    %353 = vector.broadcast %4 : vector<1x32xf32> to vector<8x32xf32>
    %354 = arith.addf %352, %353 : vector<8x32xf32>
    %355 = vector.extract_strided_slice %331 {offsets = [0, 64], sizes = [8, 32], strides = [1, 1]} : vector<8x96xf32> to vector<8x32xf32>
    %356 = vector.broadcast %5 : vector<1x32xf32> to vector<8x32xf32>
    %357 = arith.addf %355, %356 : vector<8x32xf32>
    %358 = arith.mulf %341, %357 : vector<8x32xf32>
    %359 = arith.addf %354, %358 : vector<8x32xf32>
    %360 = math.tanh %359 : vector<8x32xf32>
    %cst_106 = arith.constant 1.000000e+00 : f32
    %361 = vector.broadcast %cst_106 : f32 to vector<8x32xf32>
    %362 = arith.subf %361, %351 : vector<8x32xf32>
    %363 = arith.mulf %362, %360 : vector<8x32xf32>
    %364 = arith.mulf %351, %285 : vector<8x32xf32>
    %365 = arith.addf %363, %364 : vector<8x32xf32>
    %cst_107 = arith.constant dense<0.000000e+00> : vector<8xf32>
    %366 = vector.multi_reduction <add>, %365, %cst_107 [1] : vector<8x32xf32> to vector<8xf32>
    %367 = vector.shape_cast %366 : vector<8xf32> to vector<8x1xf32>
    %cst_108 = arith.constant 3.200000e+01 : f32
    %368 = vector.broadcast %cst_108 : f32 to vector<8x1xf32>
    %369 = arith.divf %367, %368 : vector<8x1xf32>
    %370 = arith.mulf %365, %365 : vector<8x32xf32>
    %cst_109 = arith.constant dense<0.000000e+00> : vector<8xf32>
    %371 = vector.multi_reduction <add>, %370, %cst_109 [1] : vector<8x32xf32> to vector<8xf32>
    %372 = vector.shape_cast %371 : vector<8xf32> to vector<8x1xf32>
    %cst_110 = arith.constant 3.200000e+01 : f32
    %373 = vector.broadcast %cst_110 : f32 to vector<8x1xf32>
    %374 = arith.divf %372, %373 : vector<8x1xf32>
    %375 = arith.mulf %369, %369 : vector<8x1xf32>
    %376 = arith.subf %374, %375 : vector<8x1xf32>
    %cst_111 = arith.constant 0.000000e+00 : f32
    %377 = vector.broadcast %cst_111 : f32 to vector<8x1xf32>
    %378 = arith.maximumf %376, %377 : vector<8x1xf32>
    %379 = vector.broadcast %369 : vector<8x1xf32> to vector<8x32xf32>
    %380 = arith.subf %365, %379 : vector<8x32xf32>
    %cst_112 = arith.constant 9.99999974E-6 : f32
    %381 = vector.broadcast %cst_112 : f32 to vector<8x1xf32>
    %382 = arith.addf %378, %381 : vector<8x1xf32>
    %383 = math.rsqrt %382 : vector<8x1xf32>
    %384 = vector.broadcast %383 : vector<8x1xf32> to vector<8x32xf32>
    %385 = arith.mulf %380, %384 : vector<8x32xf32>
    %cst_113 = arith.constant dense<0.000000e+00> : vector<8x64xf32>
    %386 = tpu.matmul %385, %13, %cst_113 {dimension_numbers = #tpu.dot_dimension_numbers<[1], [0], [0], [1], [0, 0, 1, 1], [], []>} : vector<8x32xf32>, vector<32x64xf32>, vector<8x64xf32> -> vector<8x64xf32>
    %387 = vector.broadcast %8 : vector<1x64xf32> to vector<8x64xf32>
    %388 = arith.addf %386, %387 : vector<8x64xf32>
    %cst_114 = arith.constant 0.000000e+00 : f32
    %389 = vector.broadcast %cst_114 : f32 to vector<8x64xf32>
    %390 = arith.maximumf %388, %389 : vector<8x64xf32>
    %cst_115 = arith.constant dense<0.000000e+00> : vector<8x32xf32>
    %391 = tpu.matmul %390, %14, %cst_115 {dimension_numbers = #tpu.dot_dimension_numbers<[1], [0], [0], [1], [0, 0, 1, 1], [], []>} : vector<8x64xf32>, vector<64x32xf32>, vector<8x32xf32> -> vector<8x32xf32>
    %392 = vector.broadcast %6 : vector<1x32xf32> to vector<8x32xf32>
    %393 = arith.addf %391, %392 : vector<8x32xf32>
    %394 = arith.addf %365, %393 : vector<8x32xf32>
    %c0_116 = arith.constant 0 : index
    %c0_117 = arith.constant 0 : index
    %395 = vector.load %arg12[%c0_116, %c0_117] : memref<8x32xf32, #tpu.memory_space<vmem>>, vector<8x32xf32>
    tpu.vector_store %arg12[%c0_116, %c0_117], %394 {strides = array<i32>} : memref<8x32xf32, #tpu.memory_space<vmem>>, vector<8x32xf32>,
    return
  }
  func.func @transform_0(%arg0: i32) -> (i32, i32) {
    %c0_i32 = arith.constant 0 : i32
    %c0_i32_0 = arith.constant 0 : i32
    return %arg0, %c0_i32 : i32, i32
  }
  func.func @transform_1(%arg0: i32) -> (i32, i32) {
    %c0_i32 = arith.constant 0 : i32
    %c0_i32_0 = arith.constant 0 : i32
    return %arg0, %c0_i32 : i32, i32
  }
  func.func @transform_2(%arg0: i32) -> (i32, i32) {
    %c0_i32 = arith.constant 0 : i32
    %c0_i32_0 = arith.constant 0 : i32
    %c0_i32_1 = arith.constant 0 : i32
    return %c0_i32, %c0_i32_0 : i32, i32
  }
  func.func @transform_3(%arg0: i32) -> (i32, i32) {
    %c0_i32 = arith.constant 0 : i32
    %c0_i32_0 = arith.constant 0 : i32
    %c0_i32_1 = arith.constant 0 : i32
    return %c0_i32, %c0_i32_0 : i32, i32
  }
  func.func @transform_4(%arg0: i32) -> (i32, i32) {
    %c0_i32 = arith.constant 0 : i32
    %c0_i32_0 = arith.constant 0 : i32
    %c0_i32_1 = arith.constant 0 : i32
    return %c0_i32, %c0_i32_0 : i32, i32
  }
  func.func @transform_5(%arg0: i32) -> (i32, i32) {
    %c0_i32 = arith.constant 0 : i32
    %c0_i32_0 = arith.constant 0 : i32
    %c0_i32_1 = arith.constant 0 : i32
    return %c0_i32, %c0_i32_0 : i32, i32
  }
  func.func @transform_6(%arg0: i32) -> (i32, i32) {
    %c0_i32 = arith.constant 0 : i32
    %c0_i32_0 = arith.constant 0 : i32
    %c0_i32_1 = arith.constant 0 : i32
    return %c0_i32, %c0_i32_0 : i32, i32
  }
  func.func @transform_7(%arg0: i32) -> (i32, i32) {
    %c0_i32 = arith.constant 0 : i32
    %c0_i32_0 = arith.constant 0 : i32
    %c0_i32_1 = arith.constant 0 : i32
    return %c0_i32, %c0_i32_0 : i32, i32
  }
  func.func @transform_8(%arg0: i32) -> (i32, i32) {
    %c0_i32 = arith.constant 0 : i32
    %c0_i32_0 = arith.constant 0 : i32
    %c0_i32_1 = arith.constant 0 : i32
    return %c0_i32, %c0_i32_0 : i32, i32
  }
  func.func @transform_9(%arg0: i32) -> (i32, i32) {
    %c0_i32 = arith.constant 0 : i32
    %c0_i32_0 = arith.constant 0 : i32
    %c0_i32_1 = arith.constant 0 : i32
    return %c0_i32, %c0_i32_0 : i32, i32
  }
  func.func @transform_10(%arg0: i32) -> (i32, i32) {
    %c0_i32 = arith.constant 0 : i32
    %c0_i32_0 = arith.constant 0 : i32
    %c0_i32_1 = arith.constant 0 : i32
    return %c0_i32, %c0_i32_0 : i32, i32
  }
  func.func @transform_11(%arg0: i32) -> (i32, i32) {
    %c0_i32 = arith.constant 0 : i32
    %c0_i32_0 = arith.constant 0 : i32
    return %arg0, %c0_i32 : i32, i32
  }
}

</mosaic_0001>

<bundles_post_ra>
// kernel: tpu_custom_call.1
= control target key start
LH: loop header
LB: loop body
LE: loop exit
PB: predicated region body
PF: predicated region fallthrough
CT: control target
= control target key end

     0   :  { %16 = vsyncpa [#allocation3], 0  ;;  %s3641_s0 = inlined_call_operand.vmem [shape: f32[32,8], index: 0, kind: input, shape index: {}]   ;;  %s3642_s1 = inlined_call_operand.hbm [shape: f32[8,32], index: 1, kind: input, shape index: {}]   ;;  %s3643_s2 = inlined_call_operand.hbm [shape: f32[6,32], index: 2, kind: input, shape index: {}]   ;;  %s3644_s3 = inlined_call_operand.vmem [shape: f32[1,64], index: 3, kind: input, shape index: {}]   ;;  %s3645_s4 = inlined_call_operand.vmem [shape: f32[1,64], index: 4, kind: input, shape index: {}]   ;;  %s3646_s5 = inlined_call_operand.hbm [shape: f32[8,64], index: 5, kind: input, shape index: {}]   ;;  %s3647_s6 = inlined_call_operand.vmem [shape: f32[32,32], index: 6, kind: input, shape index: {}]   ;;  %s3648_s7 = inlined_call_operand.vmem [shape: f32[32,96], index: 7, kind: input, shape index: {}]   ;;  %s3649_s8 = inlined_call_operand.vmem [shape: f32[32,96], index: 8, kind: input, shape index: {}]   ;;  %s3650_s9 = inlined_call_operand.vmem [shape: f32[32,64], index: 9, kind: input, shape index: {}]   ;;  %s3651_s10 = inlined_call_operand.vmem [shape: f32[64,32], index: 10, kind: input, shape index: {}]   ;;  %s3652_s11 = inlined_call_operand.hbm [shape: f32[8,32], index: 11, kind: output, shape index: {}]  }
   0x1   :  { %17 = vsyncpa [#allocation6], 0 }
   0x2   :  { %18 = vsyncpa [#allocation4], 0  ;;  %s3034_s17 = smov [#allocation5]   ;;  %s3035_s19 = smov [#allocation2]  }
   0x3   :  { %s37_s18 = sshll.u32 %s3034_s17, 4  ;;  %s27_s20 = sshll.u32 %s3035_s19, 4  ;;  %s38_s18 = int_to_ptr.vmem [resolvable:$true] %s37_s18  ;;  %s28_s20 = int_to_ptr.vmem [resolvable:$true] %s27_s20 }
   0x4   :  { %s2940_s23 = scalar_lea.hbm %s3643_s2, 128 }
   0x5   :  { %p2941_p0 = scmp.ne.s32.totalorder %s3643_s2, %s2940_s23  ;;  %p2944_p1 = scmp.lt.u32.totalorder %s2940_s23, %s3643_s2 }
   0x7   :  { %p2946_p2 = pnand %p2944_p1, %p2941_p0 }
   0x9   :  { %2949 = shalt.err (!%p2946_p2)
}
   0xa   :  { %s2950_s28 = scalar_lea.vmem %s38_s18, 128  ;;  %p2955_p4 = scmp.lt.s32.totalorder %s38_s18, %s38_s18 }
   0xb   :  { %p2951_p3 = scmp.ne.s32.totalorder %s38_s18, %s2950_s28  ;;  %p2956_p5 = scmp.lt.s32.totalorder %s2950_s28, %s2950_s28 }
   0xd   :  { %p2957_p6 = por %p2956_p5, %p2955_p4 }
   0xf   :  { %p2958_p7 = pnand %p2957_p6, %p2951_p3 }
  0x11   :  { %2961 = shalt.err (!%p2958_p7)
}
  0x12   :  { %40 = dma.hbm_to_vmem [thread:$0]  %s3643_s2, 128, %s38_s18, [#allocation6]  }
  0x13   :  { %s2962_s14 = scalar_lea.hbm %s3642_s1, 128 }
  0x14   :  { %p2963_p8 = scmp.ne.s32.totalorder %s3642_s1, %s2962_s14  ;;  %p2966_p9 = scmp.lt.u32.totalorder %s2962_s14, %s3642_s1 }
  0x16   :  { %p2968_p10 = pnand %p2966_p9, %p2963_p8 }
  0x18   :  { %2971 = shalt.err (!%p2968_p10)
}
  0x19   :  { %s2972_s21 = scalar_lea.vmem %s28_s20, 128  ;;  %p2977_p12 = scmp.lt.s32.totalorder %s28_s20, %s28_s20 }
  0x1a   :  { %p2973_p11 = scmp.ne.s32.totalorder %s28_s20, %s2972_s21  ;;  %p2978_p13 = scmp.lt.s32.totalorder %s2972_s21, %s2972_s21 }
  0x1c   :  { %p2979_p0 = por %p2978_p13, %p2977_p12 }
  0x1e   :  { %p2980_p1 = pnand %p2979_p0, %p2973_p11 }
  0x20   :  { %2983 = shalt.err (!%p2980_p1)
}
  0x21   :  { %30 = dma.hbm_to_vmem [thread:$0]  %s3642_s1, 128, %s28_s20, [#allocation3]  }
  0x22   :  { %s3036_s22 = smov [#allocation7]   ;;  %s2984_s26 = scalar_lea.hbm %s3646_s5, 128 }
  0x23   :  { %s51_s23 = sshll.u32 %s3036_s22, 4  ;;  %p2985_p2 = scmp.ne.s32.totalorder %s3646_s5, %s2984_s26  ;;  %s52_s23 = int_to_ptr.vmem [resolvable:$true] %s51_s23 }
  0x24   :  { %p2988_p3 = scmp.lt.u32.totalorder %s2984_s26, %s3646_s5 }
  0x26   :  { %p2990_p4 = pnand %p2988_p3, %p2985_p2 }
  0x28   :  { %2993 = shalt.err (!%p2990_p4)
}
  0x29   :  { %s2994_s12 = scalar_lea.vmem %s52_s23, 128  ;;  %p2999_p6 = scmp.lt.s32.totalorder %s52_s23, %s52_s23 }
  0x2a   :  { %p2995_p5 = scmp.ne.s32.totalorder %s52_s23, %s2994_s12  ;;  %p3000_p7 = scmp.lt.s32.totalorder %s2994_s12, %s2994_s12 }
  0x2c   :  { %p3001_p8 = por %p3000_p7, %p2999_p6 }
  0x2e   :  { %p3002_p9 = pnand %p3001_p8, %p2995_p5 }
  0x30   :  { %3005 = shalt.err (!%p3002_p9)
}
  0x31   :  { %54 = dma.hbm_to_vmem [thread:$0]  %s3646_s5, 128, %s52_s23, [#allocation6]  }
  0x32   :  { %3028 = dma.done.wait [#allocation3], 128  }
  0x33   :  { %3029 = vsyncadd [#allocation3], 4294967168 }
  0x34   :  { %3030 = dma.done.wait [#allocation6], 256  }
  0x35   :  { %3031 = vsyncadd [#allocation6], 4294967040  ;;  %vm125_vm0 = vcmask 64512   ;;  %v3143_v0 = vld [vmem:[%s3641_s0] sm:$0xff]  ;;  %v3148_v1 = vld [vmem:[%s3641_s0 + $0x8] sm:$0xff]  ;;  %vm295_vm1 = vcmask 261120  }
  0x36   :  { %v126_v2 = vsel %vm125_vm0, %v3143_v0, 0.0  ;;  %v143_v3 = vmul.f32 %v3143_v0, %v3143_v0  ;;  %v144_v4 = vmul.f32 %v3148_v1, %v3148_v1  ;;  %v129_v6 = vsel %vm125_vm0, %v3148_v1, 0.0  ;;  %v3162_v7 = vld [vmem:[%s3641_s0 + $0x10] sm:$0xff]  ;;  %v3168_v9 = vld [vmem:[%s3641_s0 + $0x18] sm:$0xff]  ;;  %v3178_v14 = vld [vmem:[#allocation2] sm:$0xff]  ;;  %s3040_s28 = smov 96  }
  0x37   :  { %127 = vadd.xlane.f32.xlu0 %v126_v2  ;;  %v132_v10 = vsel %vm125_vm0, %v3162_v7, 0.0  ;;  %v145_v11 = vmul.f32 %v3162_v7, %v3162_v7  ;;  %v135_v12 = vsel %vm125_vm0, %v3168_v9, 0.0  ;;  %v146_v13 = vmul.f32 %v3168_v9, %v3168_v9  ;;  %v77_v20 = vld [vmem:[#allocation7] sm:$0xff]  ;;  %v78_v2 = vld [vmem:[%s3647_s6] sm:$0xff]  ;;  %vm3230_vm3 = vmpackc.low %vm295_vm1, %vm295_vm1  ;;  %s3041_s15 = smov 64  }
  0x38   :  { %v147_v5 = vsel %vm125_vm0, %v143_v3, 0.0  ;;  %v150_v8 = vsel %vm125_vm0, %v144_v4, 0.0  ;;  %v301_v17 = vmul.f32 %v3178_v14, %v3178_v14  ;;  %v296_v18 = vsel %vm295_vm1, %v3178_v14, 0.0  ;;  %2439 = vmatprep.subr.mxu1 %v77_v20  ;;  %v79_v3 = vld [vmem:[%s3647_s6 + $0x8] sm:$0xff] }
  0x39   :  { %148 = vadd.xlane.f32.xlu1 %v147_v5  ;;  %v153_v15 = vsel %vm125_vm0, %v145_v11, 0.0  ;;  %v156_v16 = vsel %vm125_vm0, %v146_v13, 0.0  ;;  %2440 = vmatpush3.msra.mxu1 %v77_v20  ;;  %v3037_v21 = vmov 0.0|0.0   ;;  %vm3038_vm2 = vmmov 0   ;;  %v80_v11 = vld [vmem:[%s3647_s6 + $0x10] sm:$0xff] }
  0x3a   :  { %v302_v19 = vsel %vm295_vm1, %v301_v17, 0.0  ;;  %2702 = vmatprep.subr.bf16.mxu1 %v3037_v21  ;;  %2708 = vmatprep.subr.bf16.mxu0 %v3037_v21  ;;  %v3039_v22 = vmov 0.0   ;;  %vm910_vm13 = vcmask 523264  }
  0x3b   :  { %130 = vadd.xlane.f32.xlu0 %v129_v6  ;;  %2466 = vmatprep.mubr.msk.f32.mxu0 %vm3038_vm2, %v3039_v22  ;;  %v3200_v6 = vpack.c.bf16 %v79_v3, %v78_v2 }
  0x3d   :  { %151 = vadd.xlane.f32.xlu1 %v150_v8 }
  0x3f   :  { %133 = vadd.xlane.f32.xlu0 %v132_v10 }
  0x41   :  { %136 = vadd.xlane.f32.xlu1 %v135_v12  ;;  %v81_v12 = vld [vmem:[%s3647_s6 + $0x18] sm:$0xff] }
  0x43   :  { %154 = vadd.xlane.f32.xlu0 %v153_v15 }
  0x45   :  { %157 = vadd.xlane.f32.xlu1 %v156_v16 }
  0x47   :  { %297 = vadd.xlane.f32.xlu0 %v296_v18 }
  0x49   :  { %303 = vadd.xlane.f32.xlu1 %v302_v19 }
  0xc4   :  { %v128_v23 = vpop.xlane.xlu0 %127 }
  0xc5   :  { %v139_v24 = vmul.f32 0.125, %v128_v23 }
  0xc6   :  { %v149_v25 = vpop.xlane.xlu1 %148 }
  0xc7   :  { %v163_v26 = vmul.f32 %v139_v24, %v139_v24  ;;  %v159_v27 = vmul.f32 0.125, %v149_v25  ;;  %v175_v58 = vsub.f32 %v3143_v0, %v139_v24 }
  0xc8   :  { %v131_v28 = vpop.xlane.xlu0 %130 }
  0xc9   :  { %v167_v29 = vsub.f32 %v159_v27, %v163_v26  ;;  %v140_v30 = vmul.f32 0.125, %v131_v28 }
  0xca   :  { %v152_v31 = vpop.xlane.xlu1 %151 }
  0xcb   :  { %v171_v32 = vmax.f32 %v167_v29, 0.0  ;;  %v164_v33 = vmul.f32 %v140_v30, %v140_v30  ;;  %v160_v34 = vmul.f32 0.125, %v152_v31  ;;  %v176_v4 = vsub.f32 %v3148_v1, %v140_v30 }
  0xcc   :  { %v134_v35 = vpop.xlane.xlu0 %133  ;;  %v3210_v1 = vpack.c.bf16 %v81_v12, %v80_v11  ;;  %v102_v29 = vlaneseq }
  0xcd   :  { %v179_v36 = vadd.f32 1e-05, %v171_v32  ;;  %v168_v37 = vsub.f32 %v160_v34, %v164_v33  ;;  %v141_v38 = vmul.f32 0.125, %v134_v35 }
  0xce   :  { %v137_v39 = vpop.xlane.xlu1 %136  ;;  %v3240_v32 = vshrl.u32 %v102_v29, 7 }
  0xcf   :  { %2872 = vrsqrt.f32 %v179_v36  ;;  %v172_v40 = vmax.f32 %v168_v37, 0.0  ;;  %v165_v41 = vmul.f32 %v141_v38, %v141_v38  ;;  %v142_v42 = vmul.f32 0.125, %v137_v39 }
  0xd0   :  { %v155_v43 = vpop.xlane.xlu0 %154  ;;  %v177_v13 = vsub.f32 %v3162_v7, %v141_v38  ;;  %v315_v37 = vsub.s32 0, %v3240_v32  ;;  %vm107_vm6 = vcmp.lt.s32.totalorder %v3240_v32, 4  ;;  %vm113_vm8 = vcmp.ge.s32.totalorder %v3240_v32, 4 }
  0xd1   :  { %v180_v44 = vadd.f32 1e-05, %v172_v40  ;;  %v161_v45 = vmul.f32 0.125, %v155_v43  ;;  %v166_v47 = vmul.f32 %v142_v42, %v142_v42  ;;  %v178_v16 = vsub.f32 %v3168_v9, %v142_v42  ;;  %v2272_v9 = vld [vmem:[%s3644_s3] ss:$0 sm:$0xff] }
  0xd2   :  { %v158_v46 = vpop.xlane.xlu1 %157  ;;  %v3246_v40 = vld [vmem:[#allocation5] sm:$0x3f] }
  0xd3   :  { %2874 = vrsqrt.f32 %v180_v44  ;;  %v169_v48 = vsub.f32 %v161_v45, %v165_v41  ;;  %v162_v49 = vmul.f32 0.125, %v158_v46  ;;  %v3252_v43 = vrot.slane %v3246_v40, %v315_v37 }
  0xd4   :  { %v298_v50 = vpop.xlane.xlu0 %297 }
  0xd5   :  { %v173_v51 = vmax.f32 %v169_v48, 0.0  ;;  %v170_v52 = vsub.f32 %v162_v49, %v166_v47  ;;  %v300_v53 = vmul.f32 0.03125, %v298_v50  ;;  %v105_v49 = vand.u32 127, %v102_v29 }
  0xd6   :  { %v304_v54 = vpop.xlane.xlu1 %303 }
  0xd7   :  { %v181_v55 = vadd.f32 1e-05, %v173_v51  ;;  %v174_v56 = vmax.f32 %v170_v52, 0.0  ;;  %v306_v57 = vmul.f32 %v300_v53, %v300_v53  ;;  %v305_v59 = vmul.f32 0.03125, %v304_v54 }
  0xd8   :  { %v309_v20 = vsub.f32 %v3178_v14, %v300_v53  ;;  %vm116_vm4 = vcmp.ge.s32.totalorder %v105_v49, 16  ;;  %vm117_vm5 = vcmp.lt.s32.totalorder %v105_v49, 32  ;;  %vm110_vm7 = vcmp.lt.s32.totalorder %v105_v49, 16 }
  0xd9   :  { %v2873_v60 = vpop.eup %2872  ;;  %2876 = vrsqrt.f32 %v181_v55  ;;  %v182_v61 = vadd.f32 1e-05, %v174_v56  ;;  %v307_v62 = vsub.f32 %v305_v59, %v306_v57  ;;  %vm118_vm9 = vmand %vm116_vm4, %vm117_vm5 }
  0xda   :  { %v187_v63 = vmul.f32 %v2873_v60, %v175_v58  ;;  %vm112_vm10 = vmand %vm107_vm6, %vm110_vm7 }
  0xdb   :  { %2878 = vrsqrt.f32 %v182_v61  ;;  %v308_v5 = vmax.f32 %v307_v62, 0.0  ;;  %vm119_vm11 = vmand %vm113_vm8, %vm118_vm9 }
  0xdc   :  { %2441 = vmatprep.mubr.msk.f32.mxu1 %vm125_vm0, %v187_v63  ;;  %vm3265_vm12 = vmor %vm112_vm10, %vm119_vm11 }
  0xdd   :  { %v2875_v0 = vpop.eup %2874  ;;  %v310_v8 = vadd.f32 1e-05, %v308_v5 }
  0xde   :  { %v188_v10 = vmul.f32 %v2875_v0, %v176_v4 }
  0xdf   :  { %2880 = vrsqrt.f32 %v310_v8 }
  0xe0   :  { %2442 = vmatmul.mubr.msk.f32.vlgmr.msra.gmra.mrb[0].mxu1 %vm125_vm0, %v188_v10 }
  0xe1   :  { %2704 = vmatpush3.bf16.msra.mxu1 %v3200_v6 }
  0xe2   :  { %2705 = vmatprep.subr.bf16.mxu1 %v3037_v21 }
  0xe3   :  { %v2877_v15 = vpop.eup %2876 }
  0xe4   :  { %v189_v17 = vmul.f32 %v2877_v15, %v177_v13 }
  0xe5   :  { %v2879_v18 = vpop.eup %2878  ;;  %2707 = vmatpush3.bf16.msra.mxu1 %v3210_v1 }
  0xe6   :  { %2444 = vmatprep.mubr.msk.f32.mxu1 %vm125_vm0, %v189_v17  ;;  %v190_v19 = vmul.f32 %v2879_v18, %v178_v16  ;;  %2716 = vmatprep.subr.bf16.mxu1 %v3037_v21  ;;  %v86_v17 = vld [vmem:[%s3649_s8] sm:$0xff]  ;;  %v87_v18 = vld [vmem:[%s3649_s8 + $0x8] sm:$0xff] }
  0xe8   :  { %2445 = vmatmul.mubr.msk.f32.gmra.mrb[2].mxu1 %vm125_vm0, %v190_v19  ;;  %v88_v19 = vld [vmem:[%s3649_s8 + $0x10] sm:$0xff] }
  0xe9   :  { %2455 = vmatprep.mubr.msk.f32.mxu1 %vm3038_vm2, %v3039_v22  ;;  %v2881_v7 = vpop.eup %2880 }
  0xea   :  { %v312_v23 = vmul.f32 %v2881_v7, %v309_v20  ;;  %v771_v20 = vsub.s32 4, %v3240_v32  ;;  %v3287_v7 = vpack.c.bf16 %v87_v18, %v86_v17 }
  0xec   :  { %2456 = vmatmul.mubr.msk.f32.vlgmr.msra.gmra.mrb[4].mxu1 %vm295_vm1, %v312_v23  ;;  %v89_v23 = vld [vmem:[%s3649_s8 + $0x18] sm:$0xff] }
  0xed   :  { %2477 = vmatprep.mubr.msk.f32.mxu1 %vm3038_vm2, %v3039_v22 }
 0x1b3   :  { %v2443_v24 = vpop.f32.mrb[0].mxu1 }
 0x1b4   :  { %v281_v25 = vadd.f32 %v2443_v24, %v2272_v9  ;;  %v275_v26 = vpop.f32.mrb[1].mxu1  ;;  %v3294_v24 = vpack.c.bf16 %v89_v23, %v88_v19 }
 0x1b5   :  { %v276_v27 = vadd.f32 %v2272_v9, %v275_v26 }
 0x1b7   :  { %v2862_v30 = vpack.i.bf16 %v281_v25, %v276_v27  ;;  %v3234_v31 = vpack.c.bf16 %v281_v25, %v276_v27 }
 0x1b9   :  { %2863 = vrot.lane.b32.xlu1 %v2862_v30, %s3040_s28  ;;  %2711 = vmatpush3.bf16.xpose.msk.msra.mxu0 %vm3230_vm3, %v3234_v31 }
 0x1ba   :  { %2712 = vmatprep.subr.bf16.mxu0 %v3037_v21 }
 0x1bb   :  { %v2446_v33 = vpop.f32.mrb[2].mxu1 }
 0x1bc   :  { %v291_v34 = vadd.f32 %v2446_v33, %v2272_v9  ;;  %v285_v35 = vpop.f32.mrb[3].mxu1  ;;  %v82_v33 = vld [vmem:[%s3648_s7] sm:$0xff] }
 0x1bd   :  { %v286_v36 = vadd.f32 %v2272_v9, %v285_v35  ;;  %v772_v9 = vrot.slane %v3246_v40, %v771_v20 }
 0x1bf   :  { %v2867_v38 = vpack.i.bf16 %v291_v34, %v286_v36  ;;  %v3244_v39 = vpack.c.bf16 %v291_v34, %v286_v36  ;;  %v386_v41 = vpop.f32.mrb[4].mxu1  ;;  %774 = vrot.lane.b32.xlu1 %v772_v9, %s3041_s15  ;;  %v83_v34 = vld [vmem:[%s3648_s7 + $0x8] sm:$0xff] }
 0x1c0   :  { %v2457_v42 = vpop.f32.mrb[5].mxu1  ;;  %v387_v44 = vadd.f32 %v386_v41, %v3252_v43  ;;  %v3314_v36 = vpack.c.bf16 %v83_v34, %v82_v33  ;;  %v85_v41 = vld [vmem:[%s3648_s7 + $0x18] sm:$0xff] }
 0x1c1   :  { %2715 = vmatpush3.bf16.xpose.msk.msra.mxu0 %vm3230_vm3, %v3244_v39 }
 0x1c2   :  { %2728 = vmatprep.subr.bf16.mxu0 %v3037_v21 }
 0x1c8   :  { %2467 = vmatmul.mubr.msk.f32.vlgmr.msra.gmra.mrb[0].mxu0 %vm295_vm1, %v387_v44 }
 0x1c9   :  { %2499 = vmatprep.mubr.msk.f32.mxu0 %vm3038_vm2, %v3039_v22  ;;  %2730 = vmatpush3.bf16.msra.mxu0 %v3287_v7 }
 0x1ca   :  { %2731 = vmatprep.subr.bf16.mxu0 %v3037_v21 }
 0x1cd   :  { %2733 = vmatpush3.bf16.msra.mxu0 %v3294_v24 }
 0x1ce   :  { %2740 = vmatprep.subr.bf16.mxu0 %v3037_v21 }
 0x1d0   :  { %2500 = vmatmul.mubr.msk.f32.vlgmr.msra.gmra.mrb[2].mxu0 %vm295_vm1, %v3178_v14 }
 0x1d1   :  { %2529 = vmatprep.mubr.msk.f32.mxu0 %vm3038_vm2, %v3039_v22 }
 0x22b   :  { %v2864_v45 = vpop.permute.xlu1 %2863 }
 0x22c   :  { %v2866_v46 = vunpack.i.h.bf16 %v2864_v45  ;;  %v2865_v47 = vunpack.i.l.bf16 %v2864_v45  ;;  %v762_v45 = vsub.s32 3, %v3240_v32 }
 0x22e   :  { %v3259_v48 = vpack.c.bf16 %v2866_v46, %v2865_v47 }
 0x230   :  { %2718 = vmatpush3.bf16.msra.mxu1 %v3259_v48 }
 0x231   :  { %2719 = vmatprep.subr.bf16.mxu1 %v3037_v21  ;;  %v3331_v44 = vpop.permute.xlu1 %774 }
 0x29b   :  { %v471_v51 = vpop.f32.mrb[0].mxu0 }
 0x29c   :  { %v475_v52 = vsel %vm3265_vm12, %v471_v51, -1e+30  ;;  %v2468_v53 = vpop.f32.mrb[1].mxu0  ;;  %v763_v51 = vrot.slane %v3246_v40, %v762_v45 }
 0x29d   :  { %v476_v54 = vsel %vm295_vm1, %v475_v52, -inf }
 0x29e   :  { %v477_v55 = vrot.slane %v476_v54, 4 }
 0x2a0   :  { %v478_v56 = vmax.f32 %v476_v54, %v477_v55 }
 0x2a2   :  { %v479_v57 = vrot.slane %v478_v56, 2 }
 0x2a3   :  { %v729_v46 = vpop.f32.mrb[2].mxu0 }
 0x2a4   :  { %v480_v58 = vmax.f32 %v478_v56, %v479_v57  ;;  %v777_v47 = vadd.f32 %v3331_v44, %v729_v46  ;;  %v2501_v49 = vpop.f32.mrb[3].mxu0  ;;  %v736_v56 = vsub.s32 1, %v3240_v32 }
 0x2a6   :  { %v481_v59 = vrot.slane %v480_v58, 1  ;;  %779 = vrot.lane.b32.xlu1 %v777_v47, %s3041_s15  ;;  %v3348_v57 = vrot.slane %v3246_v40, %v736_v56 }
 0x2a8   :  { %v482_v60 = vmax.f32 %v480_v58, %v481_v59 }
 0x2aa   :  { %v483_v61 = vsub.f32 %v475_v52, %v482_v60  ;;  %v747_v52 = vsub.s32 2, %v3240_v32  ;;  %765 = vrot.lane.b32.xlu1 %v763_v51, %s3041_s15 }
 0x2ac   :  { %v484_v62 = vmul.f32 1.442695, %v483_v61  ;;  %v748_v53 = vrot.slane %v3246_v40, %v747_v52 }
 0x2ae   :  { %2882 = vpow2.f32 %v484_v62 }
 0x2b8   :  { %v2883_v63 = vpop.eup %2882 }
 0x2b9   :  { %v486_v2 = vsel %vm295_vm1, %v2883_v63, 0.0 }
 0x2ba   :  { %v487_v3 = vrot.slane %v486_v2, 4 }
 0x2bc   :  { %v488_v4 = vadd.f32 %v487_v3, %v486_v2 }
 0x2be   :  { %v489_v5 = vrot.slane %v488_v4, 2 }
 0x2c0   :  { %v490_v0 = vadd.f32 %v489_v5, %v488_v4 }
 0x2c2   :  { %v491_v8 = vrot.slane %v490_v0, 1 }
 0x2c4   :  { %v492_v10 = vadd.f32 %v491_v8, %v490_v0 }
 0x2c6   :  { %2884 = vrcp.f32 %v492_v10 }
 0x2d0   :  { %v2885_v11 = vpop.eup %2884 }
 0x2d1   :  { %v494_v12 = vmul.f32 %v2885_v11, %v2883_v63 }
 0x2d3   :  { %v495_v13 = vadd.f32 1e-06, %v494_v12 }
 0x2d5   :  { %v496_v15 = vsel %vm3265_vm12, %v495_v13, 0.0 }
 0x2d6   :  { %v497_v16 = vsel %vm295_vm1, %v496_v15, 0.0 }
 0x2d7   :  { %498 = vadd.xlane.f32.xlu0 %v497_v16 }
 0x2ed   :  { %2868 = vrot.lane.b32.xlu0 %v2867_v38, %s3040_s28  ;;  %v84_v38 = vld [vmem:[%s3648_s7 + $0x10] sm:$0xff]  ;;  %s3042_s7 = smov 32  }
 0x2ee   :  { %v3324_v42 = vpack.c.bf16 %v85_v41, %v84_v38  ;;  %750 = vrot.lane.b32.xlu1 %v748_v53, %s3042_s7  ;;  %v91_v38 = vld [vmem:[%s3650_s9 + $0x8] sm:$0xff]  ;;  %v92_v41 = vld [vmem:[%s3650_s9 + $0x10] sm:$0xff] }
 0x2f2   :  { %795 = vrot.lane.b32.xlu1 %v3178_v14, %s3042_s7 }
 0x318   :  { %v780_v3 = vpop.permute.xlu1 %779 }
 0x31c   :  { %v3352_v5 = vpop.permute.xlu1 %765 }
 0x360   :  { %v3356_v12 = vpop.permute.xlu1 %750 }
 0x364   :  { %v499_v25 = vpop.xlane.xlu0 %498  ;;  %v796_v19 = vpop.permute.xlu1 %795 }
 0x365   :  { %2886 = vrcp.f32 %v499_v25 }
 0x368   :  { %v2869_v26 = vpop.permute.xlu0 %2868 }
 0x369   :  { %v2871_v27 = vunpack.i.h.bf16 %v2869_v26  ;;  %v2870_v29 = vunpack.i.l.bf16 %v2869_v26 }
 0x36b   :  { %v3304_v30 = vpack.c.bf16 %v2871_v27, %v2870_v29 }
 0x36d   :  { %2721 = vmatpush3.bf16.msra.mxu1 %v3304_v30 }
 0x36e   :  { %2722 = vmatprep.subr.bf16.mxu1 %v3037_v21 }
 0x36f   :  { %v2887_v35 = vpop.eup %2886 }
 0x370   :  { %v501_v37 = vmul.f32 %v2887_v35, %v496_v15 }
 0x372   :  { %2478 = vmatmul.mubr.msk.f32.vlgmr.msra.gmra.mrb[6].mxu1 %vm295_vm1, %v501_v37  ;;  %v90_v37 = vld [vmem:[%s3650_s9] sm:$0xff] }
 0x373   :  { %2724 = vmatpush3.bf16.msra.mxu1 %v3314_v36  ;;  %2488 = vmatprep.mubr.msk.f32.mxu1 %vm3038_vm2, %v3039_v22  ;;  %v3377_v45 = vpack.c.bf16 %v91_v38, %v90_v37 }
 0x374   :  { %2725 = vmatprep.subr.bf16.mxu1 %v3037_v21 }
 0x377   :  { %2727 = vmatpush3.bf16.msra.mxu1 %v3324_v42 }
 0x378   :  { %2734 = vmatprep.subr.bf16.mxu1 %v3037_v21 }
 0x445   :  { %v583_v54 = vpop.f32.mrb[6].mxu1 }
 0x446   :  { %v2479_v55 = vpop.f32.mrb[7].mxu1  ;;  %2489 = vmatmul.mubr.msk.f32.vlgmr.msra.gmra.mrb[8].mxu1 %vm295_vm1, %v583_v54 }
 0x447   :  { %2510 = vmatprep.mubr.msk.f32.mxu1 %vm3038_vm2, %v3039_v22  ;;  %2736 = vmatpush3.bf16.msra.mxu1 %v3377_v45 }
 0x448   :  { %2737 = vmatprep.subr.bf16.mxu1 %v3037_v21 }
 0x519   :  { %v656_v58 = vpop.f32.mrb[8].mxu1 }
 0x51a   :  { %v733_v59 = vadd.f32 %v729_v46, %v656_v58  ;;  %v2490_v60 = vpop.f32.mrb[9].mxu1  ;;  %v768_v0 = vadd.f32 %v3352_v5, %v656_v58  ;;  %v93_v46 = vld [vmem:[%s3650_s9 + $0x18] sm:$0xff] }
 0x51b   :  { %v3383_v47 = vpack.c.bf16 %v93_v46, %v92_v41  ;;  %v95_v60 = vld [vmem:[%s3651_s10 + $0x8] sm:$0xff] }
 0x51c   :  { %v738_v61 = vadd.f32 %v3348_v57, %v733_v59  ;;  %v753_v13 = vadd.f32 %v3356_v12, %v733_v59  ;;  %v94_v59 = vld [vmem:[%s3651_s10] sm:$0xff] }
 0x51d   :  { %2739 = vmatpush3.bf16.msra.mxu1 %v3383_v47 }
 0x51e   :  { %v2286_v62 = vmul.f32 -1.442695, %v738_v61  ;;  %v2287_v15 = vmul.f32 -1.442695, %v753_v13  ;;  %2752 = vmatprep.subr.bf16.mxu1 %v3037_v21  ;;  %v96_v61 = vld [vmem:[%s3651_s10 + $0x10] sm:$0xff] }
 0x51f   :  { %v100_v13 = vld [vmem:[%s3651_s10 + $0x30] sm:$0xff] }
 0x520   :  { %2888 = vpow2.f32 %v2286_v62  ;;  %v3397_v62 = vpack.c.bf16 %v95_v60, %v94_v59 }
 0x522   :  { %2742 = vmatpush3.bf16.msra.mxu0 %v3397_v62 }
 0x523   :  { %2743 = vmatprep.subr.bf16.mxu0 %v3037_v21 }
 0x52a   :  { %v2889_v14 = vpop.eup %2888 }
 0x52b   :  { %v742_v63 = vadd.f32 1.0, %v2889_v14  ;;  %v97_v14 = vld [vmem:[%s3651_s10 + $0x18] sm:$0xff] }
 0x52d   :  { %2890 = vrcp.f32 %v742_v63  ;;  %v3403_v63 = vpack.c.bf16 %v97_v14, %v96_v61 }
 0x52f   :  { %2745 = vmatpush3.bf16.msra.mxu0 %v3403_v63 }
 0x530   :  { %2746 = vmatprep.subr.bf16.mxu0 %v3037_v21 }
 0x537   :  { %v2891_v2 = vpop.eup %2890 }
 0x538   :  { %v782_v4 = vmul.f32 %v2891_v2, %v780_v3  ;;  %v98_v2 = vld [vmem:[%s3651_s10 + $0x20] sm:$0xff]  ;;  %v99_v3 = vld [vmem:[%s3651_s10 + $0x28] sm:$0xff] }
 0x53a   :  { %784 = vrot.lane.b32.xlu0 %v782_v4, %s3041_s15  ;;  %v3413_v4 = vpack.c.bf16 %v99_v3, %v98_v2 }
 0x53c   :  { %2748 = vmatpush3.bf16.msra.mxu0 %v3413_v4 }
 0x53d   :  { %2749 = vmatprep.subr.bf16.mxu0 %v3037_v21 }
 0x5ac   :  { %v785_v8 = vpop.permute.xlu0 %784 }
 0x5ad   :  { %v787_v10 = vadd.f32 %v785_v8, %v768_v0 }
 0x5af   :  { %2892 = vtanh.f32 %v787_v10 }
 0x5b0   :  { %2894 = vpow2.f32 %v2287_v15  ;;  %v101_v15 = vld [vmem:[%s3651_s10 + $0x38] sm:$0xff] }
 0x5b9   :  { %v2893_v11 = vpop.eup %2892 }
 0x5ba   :  { %791 = vrot.lane.b32.xlu0 %v2893_v11, %s3040_s28  ;;  %v2895_v16 = vpop.eup %2894 }
 0x5bb   :  { %v757_v17 = vadd.f32 1.0, %v2895_v16  ;;  %v3433_v16 = vpack.c.bf16 %v101_v15, %v100_v13 }
 0x5bd   :  { %2896 = vrcp.f32 %v757_v17  ;;  %2751 = vmatpush3.bf16.msra.mxu0 %v3433_v16  ;;  %v3440_v17 = vld [vmem:[%s3645_s4] ss:$0 sm:$0xff]  ;;  %s3043_s4 = smov [#allocation8]  }
 0x5be   :  { %2766 = vmatprep.subr.bf16.mxu0 %v3037_v21  ;;  %s2262_s10 = sshll.u32 %s3043_s4, 4  ;;  %s2263_s10 = int_to_ptr.vmem [resolvable:$true] %s2262_s10 }
 0x5bf   :  { %p3011_p11 = scmp.lt.s32.totalorder %s2263_s10, %s2263_s10 }
 0x5c7   :  { %v2897_v18 = vpop.eup %2896 }
 0x5c8   :  { %v789_v20 = vsub.f32 1.0, %v2897_v18  ;;  %v798_v9 = vmul.f32 %v2897_v18, %v796_v19 }
 0x62c   :  { %v792_v23 = vpop.permute.xlu0 %791 }
 0x62d   :  { %v794_v25 = vmul.f32 %v792_v23, %v789_v20 }
 0x62f   :  { %v3359_v26 = vadd.f32 %v798_v9, %v794_v25  ;;  %v908_v9 = vsub.s32 5, %v3240_v32 }
 0x631   :  { %801 = vrot.lane.b32.xlu0 %v3359_v26, %s3040_s28  ;;  %v808_v27 = vmul.f32 %v3359_v26, %v3359_v26  ;;  %v3452_v25 = vrot.slane %v3246_v40, %v908_v9 }
 0x633   :  { %810 = vrot.lane.b32.xlu1 %v808_v27, %s3040_s28 }
 0x6a3   :  { %v802_v29 = vpop.permute.xlu0 %801 }
 0x6a4   :  { %v804_v33 = vsel %vm295_vm1, %v802_v29, 0.0 }
 0x6a5   :  { %805 = vadd.xlane.f32.xlu0 %v804_v33  ;;  %v811_v34 = vpop.permute.xlu1 %810 }
 0x6a6   :  { %v813_v35 = vsel %vm295_vm1, %v811_v34, 0.0 }
 0x6a7   :  { %814 = vadd.xlane.f32.xlu1 %v813_v35 }
 0x732   :  { %v806_v49 = vpop.xlane.xlu0 %805 }
 0x733   :  { %v807_v51 = vmul.f32 0.03125, %v806_v49 }
 0x734   :  { %v815_v52 = vpop.xlane.xlu1 %814 }
 0x735   :  { %v817_v53 = vmul.f32 %v807_v51, %v807_v51  ;;  %v816_v54 = vmul.f32 0.03125, %v815_v52  ;;  %v820_v0 = vsub.f32 %v3359_v26, %v807_v51 }
 0x737   :  { %v818_v55 = vsub.f32 %v816_v54, %v817_v53 }
 0x739   :  { %v819_v56 = vmax.f32 %v818_v55, 0.0 }
 0x73b   :  { %v821_v58 = vadd.f32 1e-05, %v819_v56 }
 0x73d   :  { %2898 = vrsqrt.f32 %v821_v58 }
 0x747   :  { %v2899_v8 = vpop.eup %2898 }
 0x748   :  { %v823_v10 = vmul.f32 %v2899_v8, %v820_v0 }
 0x74a   :  { %831 = vrot.lane.b32.xlu0 %v823_v10, %s3040_s28 }
 0x7bc   :  { %v832_v11 = vpop.permute.xlu0 %831 }
 0x7bd   :  { %2511 = vmatmul.mubr.msk.f32.vlgmr.msra.gmra.mrb[10].mxu1 %vm295_vm1, %v832_v11 }
 0x7be   :  { %2754 = vmatpush3.bf16.msra.mxu1 %v3200_v6  ;;  %2540 = vmatprep.mubr.msk.f32.mxu1 %vm3038_vm2, %v3039_v22 }
 0x7bf   :  { %2755 = vmatprep.subr.bf16.mxu1 %v3037_v21 }
 0x7c2   :  { %2757 = vmatpush3.bf16.msra.mxu1 %v3210_v1 }
 0x7c3   :  { %2758 = vmatprep.subr.bf16.mxu1 %v3037_v21 }
 0x890   :  { %v901_v18 = vpop.f32.mrb[10].mxu1 }
 0x891   :  { %v902_v19 = vadd.f32 %v3440_v17, %v901_v18  ;;  %v2512_v20 = vpop.f32.mrb[11].mxu1 }
 0x893   :  { %v905_v23 = vmax.f32 %v902_v19, 0.0 }
 0x895   :  { %2530 = vmatmul.mubr.msk.f32.vlgmr.msra.gmra.mrb[4].mxu0 %vm910_vm13, %v905_v23 }
 0x896   :  { %2768 = vmatpush3.bf16.msra.mxu0 %v3259_v48  ;;  %2562 = vmatprep.mubr.msk.f32.mxu0 %vm3038_vm2, %v3039_v22 }
 0x897   :  { %2769 = vmatprep.subr.bf16.mxu0 %v3037_v21 }
 0x89a   :  { %2771 = vmatpush3.bf16.msra.mxu0 %v3304_v30 }
 0x89b   :  { %2772 = vmatprep.subr.bf16.mxu0 %v3037_v21 }
 0x968   :  { %v980_v27 = vpop.f32.mrb[4].mxu0 }
 0x969   :  { %v981_v29 = vadd.f32 %v980_v27, %v3452_v25  ;;  %v2531_v33 = vpop.f32.mrb[5].mxu0 }
 0x96b   :  { %985 = vrot.lane.b32.xlu1 %v981_v29, %s3042_s7 }
 0x9dd   :  { %v986_v34 = vpop.permute.xlu1 %985 }
 0x9de   :  { %v3457_v35 = vadd.f32 %v986_v34, %v3359_v26 }
 0x9e0   :  { %990 = vrot.lane.b32.xlu0 %v3457_v35, %s3040_s28  ;;  %v997_v37 = vmul.f32 %v3457_v35, %v3457_v35 }
 0x9e2   :  { %999 = vrot.lane.b32.xlu1 %v997_v37, %s3040_s28 }
 0xa52   :  { %v991_v32 = vpop.permute.xlu0 %990 }
 0xa53   :  { %v993_v40 = vsel %vm295_vm1, %v991_v32, 0.0 }
 0xa54   :  { %994 = vadd.xlane.f32.xlu0 %v993_v40  ;;  %v1000_v38 = vpop.permute.xlu1 %999 }
 0xa55   :  { %v1002_v41 = vsel %vm295_vm1, %v1000_v38, 0.0 }
 0xa56   :  { %1003 = vadd.xlane.f32.xlu1 %v1002_v41 }
 0xae1   :  { %v995_v46 = vpop.xlane.xlu0 %994 }
 0xae2   :  { %v996_v49 = vmul.f32 0.03125, %v995_v46 }
 0xae3   :  { %v1004_v26 = vpop.xlane.xlu1 %1003 }
 0xae4   :  { %v1006_v51 = vmul.f32 %v996_v49, %v996_v49  ;;  %v1005_v52 = vmul.f32 0.03125, %v1004_v26  ;;  %v1009_v56 = vsub.f32 %v3457_v35, %v996_v49 }
 0xae6   :  { %v1007_v53 = vsub.f32 %v1005_v52, %v1006_v51 }
 0xae8   :  { %v1008_v54 = vmax.f32 %v1007_v53, 0.0 }
 0xaea   :  { %v1010_v55 = vadd.f32 1e-05, %v1008_v54 }
 0xaec   :  { %2900 = vrsqrt.f32 %v1010_v55 }
 0xaf6   :  { %v2901_v58 = vpop.eup %2900 }
 0xaf7   :  { %v1012_v59 = vmul.f32 %v2901_v58, %v1009_v56 }
 0xaf9   :  { %1014 = vrot.lane.b32.xlu0 %v1012_v59, %s3040_s28 }
 0xb6b   :  { %v1015_v60 = vpop.permute.xlu0 %1014 }
 0xb6c   :  { %2541 = vmatmul.mubr.msk.f32.vlgmr.msra.gmra.mrb[12].mxu1 %vm295_vm1, %v1015_v60 }
 0xb6d   :  { %2761 = vmatpush3.bf16.xpose.msk.msra.mxu1 %vm3230_vm3, %v3234_v31  ;;  %2551 = vmatprep.mubr.msk.f32.mxu1 %vm3038_vm2, %v3039_v22 }
 0xb6e   :  { %2762 = vmatprep.subr.bf16.mxu1 %v3037_v21 }
 0xb75   :  { %2765 = vmatpush3.bf16.xpose.msk.msra.mxu1 %vm3230_vm3, %v3244_v39 }
 0xb76   :  { %2778 = vmatprep.subr.bf16.mxu1 %v3037_v21 }
 0xc3f   :  { %v1084_v61 = vpop.f32.mrb[12].mxu1 }
 0xc40   :  { %v1085_v14 = vadd.f32 %v1084_v61, %v3252_v43  ;;  %v2542_v2 = vpop.f32.mrb[13].mxu1 }
 0xc42   :  { %2552 = vmatmul.mubr.msk.f32.vlgmr.msra.gmra.mrb[14].mxu1 %vm295_vm1, %v1085_v14 }
 0xc43   :  { %2780 = vmatpush3.bf16.msra.mxu1 %v3287_v7  ;;  %2584 = vmatprep.mubr.msk.f32.mxu1 %vm3038_vm2, %v3039_v22 }
 0xc44   :  { %2781 = vmatprep.subr.bf16.mxu1 %v3037_v21 }
 0xc47   :  { %2783 = vmatpush3.bf16.msra.mxu1 %v3294_v24 }
 0xc48   :  { %2790 = vmatprep.subr.bf16.mxu1 %v3037_v21 }
 0xc4a   :  { %2585 = vmatmul.mubr.msk.f32.vlgmr.msra.gmra.mrb[16].mxu1 %vm295_vm1, %v991_v32 }
 0xc4b   :  { %2792 = vmatpush3.bf16.msra.mxu1 %v3397_v62  ;;  %2614 = vmatprep.mubr.msk.f32.mxu1 %vm3038_vm2, %v3039_v22 }
 0xc4c   :  { %2793 = vmatprep.subr.bf16.mxu1 %v3037_v21 }
 0xc4f   :  { %2795 = vmatpush3.bf16.msra.mxu1 %v3403_v63 }
 0xc50   :  { %2796 = vmatprep.subr.bf16.mxu1 %v3037_v21 }
 0xc53   :  { %2798 = vmatpush3.bf16.msra.mxu1 %v3413_v4 }
 0xc54   :  { %2799 = vmatprep.subr.bf16.mxu1 %v3037_v21 }
 0xc57   :  { %2801 = vmatpush3.bf16.msra.mxu1 %v3433_v16 }
 0xc58   :  { %2816 = vmatprep.subr.bf16.mxu1 %v3037_v21 }
 0xd15   :  { %v1157_v3 = vpop.f32.mrb[14].mxu1 }
 0xd16   :  { %v1161_v0 = vsel %vm3265_vm12, %v1157_v3, -1e+30  ;;  %v2553_v8 = vpop.f32.mrb[15].mxu1 }
 0xd17   :  { %v1162_v10 = vsel %vm295_vm1, %v1161_v0, -inf }
 0xd18   :  { %v1163_v11 = vrot.slane %v1162_v10, 4 }
 0xd1a   :  { %v1164_v13 = vmax.f32 %v1162_v10, %v1163_v11 }
 0xd1c   :  { %v1165_v15 = vrot.slane %v1164_v13, 2 }
 0xd1d   :  { %v1402_v18 = vpop.f32.mrb[16].mxu1 }
 0xd1e   :  { %v1166_v19 = vmax.f32 %v1164_v13, %v1165_v15  ;;  %v2586_v20 = vpop.f32.mrb[17].mxu1  ;;  %v1422_v54 = vadd.f32 %v1402_v18, %v3331_v44 }
 0xd20   :  { %v1167_v23 = vrot.slane %v1166_v19, 1 }
 0xd22   :  { %v1168_v9 = vmax.f32 %v1166_v19, %v1167_v23 }
 0xd24   :  { %v1169_v27 = vsub.f32 %v1161_v0, %v1168_v9 }
 0xd26   :  { %v1170_v29 = vmul.f32 1.442695, %v1169_v27 }
 0xd28   :  { %2902 = vpow2.f32 %v1170_v29 }
 0xd32   :  { %v2903_v33 = vpop.eup %2902 }
 0xd33   :  { %v1172_v34 = vsel %vm295_vm1, %v2903_v33, 0.0 }
 0xd34   :  { %v1173_v37 = vrot.slane %v1172_v34, 4 }
 0xd36   :  { %v1174_v32 = vadd.f32 %v1173_v37, %v1172_v34 }
 0xd38   :  { %v1175_v40 = vrot.slane %v1174_v32, 2 }
 0xd3a   :  { %v1176_v38 = vadd.f32 %v1175_v40, %v1174_v32 }
 0xd3c   :  { %v1177_v41 = vrot.slane %v1176_v38, 1 }
 0xd3e   :  { %v1178_v46 = vadd.f32 %v1177_v41, %v1176_v38 }
 0xd40   :  { %2904 = vrcp.f32 %v1178_v46 }
 0xd4a   :  { %v2905_v49 = vpop.eup %2904 }
 0xd4b   :  { %v1180_v26 = vmul.f32 %v2905_v49, %v2903_v33 }
 0xd4d   :  { %v1181_v51 = vadd.f32 1e-06, %v1180_v26 }
 0xd4f   :  { %v1182_v52 = vsel %vm3265_vm12, %v1181_v51, 0.0 }
 0xd50   :  { %v1183_v53 = vsel %vm295_vm1, %v1182_v52, 0.0 }
 0xd51   :  { %1184 = vadd.xlane.f32.xlu1 %v1183_v53 }
 0xd62   :  { %1424 = vrot.lane.b32.xlu1 %v1422_v54, %s3041_s15 }
 0xdde   :  { %v1185_v55 = vpop.xlane.xlu1 %1184 }
 0xddf   :  { %2906 = vrcp.f32 %v1185_v55 }
 0xde2   :  { %v1425_v13 = vpop.permute.xlu1 %1424 }
 0xde9   :  { %v2907_v56 = vpop.eup %2906 }
 0xdea   :  { %v1187_v58 = vmul.f32 %v2907_v56, %v1182_v52 }
 0xdec   :  { %2563 = vmatmul.mubr.msk.f32.vlgmr.msra.gmra.mrb[6].mxu0 %vm295_vm1, %v1187_v58 }
 0xded   :  { %2774 = vmatpush3.bf16.msra.mxu0 %v3314_v36  ;;  %2573 = vmatprep.mubr.msk.f32.mxu0 %vm3038_vm2, %v3039_v22 }
 0xdee   :  { %2775 = vmatprep.subr.bf16.mxu0 %v3037_v21 }
 0xdf1   :  { %2777 = vmatpush3.bf16.msra.mxu0 %v3324_v42 }
 0xdf2   :  { %2784 = vmatprep.subr.bf16.mxu0 %v3037_v21 }
 0xebf   :  { %v1257_v59 = vpop.f32.mrb[6].mxu0 }
 0xec0   :  { %v2564_v60 = vpop.f32.mrb[7].mxu0  ;;  %2574 = vmatmul.mubr.msk.f32.vlgmr.msra.gmra.mrb[8].mxu0 %vm295_vm1, %v1257_v59 }
 0xec1   :  { %2786 = vmatpush3.bf16.msra.mxu0 %v3377_v45  ;;  %2595 = vmatprep.mubr.msk.f32.mxu0 %vm3038_vm2, %v3039_v22 }
 0xec2   :  { %2787 = vmatprep.subr.bf16.mxu0 %v3037_v21 }
 0xec5   :  { %2789 = vmatpush3.bf16.msra.mxu0 %v3383_v47 }
 0xec6   :  { %2802 = vmatprep.subr.bf16.mxu0 %v3037_v21 }
 0xf93   :  { %v1330_v61 = vpop.f32.mrb[8].mxu0 }
 0xf94   :  { %v1406_v14 = vadd.f32 %v1402_v18, %v1330_v61  ;;  %v2575_v2 = vpop.f32.mrb[9].mxu0  ;;  %v1421_v19 = vadd.f32 %v1330_v61, %v3352_v5 }
 0xf96   :  { %v1407_v3 = vadd.f32 %v1406_v14, %v3348_v57  ;;  %v1414_v18 = vadd.f32 %v1406_v14, %v3356_v12 }
 0xf98   :  { %v2300_v0 = vmul.f32 -1.442695, %v1407_v3  ;;  %v2301_v27 = vmul.f32 -1.442695, %v1414_v18 }
 0xf9a   :  { %2908 = vpow2.f32 %v2300_v0 }
 0xfa4   :  { %v2909_v8 = vpop.eup %2908 }
 0xfa5   :  { %v1411_v10 = vadd.f32 1.0, %v2909_v8 }
 0xfa7   :  { %2910 = vrcp.f32 %v1411_v10 }
 0xfb1   :  { %v2911_v11 = vpop.eup %2910 }
 0xfb2   :  { %v1427_v15 = vmul.f32 %v2911_v11, %v1425_v13 }
 0xfb4   :  { %1429 = vrot.lane.b32.xlu0 %v1427_v15, %s3041_s15 }
0x1026   :  { %v1430_v20 = vpop.permute.xlu0 %1429 }
0x1027   :  { %v1432_v23 = vadd.f32 %v1430_v20, %v1421_v19 }
0x1029   :  { %2912 = vtanh.f32 %v1432_v23 }
0x102a   :  { %2914 = vpow2.f32 %v2301_v27 }
0x1033   :  { %v2913_v9 = vpop.eup %2912 }
0x1034   :  { %1436 = vrot.lane.b32.xlu0 %v2913_v9, %s3040_s28  ;;  %v2915_v29 = vpop.eup %2914 }
0x1035   :  { %v1418_v33 = vadd.f32 1.0, %v2915_v29 }
0x1037   :  { %2916 = vrcp.f32 %v1418_v33 }
0x1041   :  { %v2917_v34 = vpop.eup %2916 }
0x1042   :  { %v1434_v37 = vsub.f32 1.0, %v2917_v34  ;;  %v1440_v40 = vmul.f32 %v2917_v34, %v3457_v35 }
0x10a6   :  { %v1437_v32 = vpop.permute.xlu0 %1436 }
0x10a7   :  { %v1439_v38 = vmul.f32 %v1437_v32, %v1434_v37 }
0x10a9   :  { %v1441_v41 = vadd.f32 %v1440_v40, %v1439_v38 }
0x10ab   :  { %1443 = vrot.lane.b32.xlu1 %v1441_v41, %s3040_s28  ;;  %v1450_v46 = vmul.f32 %v1441_v41, %v1441_v41 }
0x10ad   :  { %1452 = vrot.lane.b32.xlu0 %v1450_v46, %s3040_s28 }
0x111d   :  { %v1444_v49 = vpop.permute.xlu1 %1443 }
0x111e   :  { %v1446_v26 = vsel %vm295_vm1, %v1444_v49, 0.0 }
0x111f   :  { %1447 = vadd.xlane.f32.xlu1 %v1446_v26  ;;  %v1453_v51 = vpop.permute.xlu0 %1452 }
0x1120   :  { %v1455_v52 = vsel %vm295_vm1, %v1453_v51, 0.0 }
0x1121   :  { %1456 = vadd.xlane.f32.xlu0 %v1455_v52 }
0x11ac   :  { %v1448_v53 = vpop.xlane.xlu1 %1447 }
0x11ad   :  { %v1449_v54 = vmul.f32 0.03125, %v1448_v53 }
0x11ae   :  { %v1457_v55 = vpop.xlane.xlu0 %1456 }
0x11af   :  { %v1459_v56 = vmul.f32 %v1449_v54, %v1449_v54  ;;  %v1458_v35 = vmul.f32 0.03125, %v1457_v55  ;;  %v1462_v61 = vsub.f32 %v1441_v41, %v1449_v54 }
0x11b1   :  { %v1460_v58 = vsub.f32 %v1458_v35, %v1459_v56 }
0x11b3   :  { %v1461_v59 = vmax.f32 %v1460_v58, 0.0 }
0x11b5   :  { %v1463_v60 = vadd.f32 1e-05, %v1461_v59 }
0x11b7   :  { %2918 = vrsqrt.f32 %v1463_v60 }
0x11c1   :  { %v2919_v14 = vpop.eup %2918 }
0x11c2   :  { %v1465_v2 = vmul.f32 %v2919_v14, %v1462_v61 }
0x11c4   :  { %1467 = vrot.lane.b32.xlu0 %v1465_v2, %s3040_s28 }
0x1236   :  { %v1468_v3 = vpop.permute.xlu0 %1467 }
0x1237   :  { %2596 = vmatmul.mubr.msk.f32.vlgmr.msra.gmra.mrb[10].mxu0 %vm295_vm1, %v1468_v3 }
0x1238   :  { %2804 = vmatpush3.bf16.msra.mxu0 %v3200_v6  ;;  %2625 = vmatprep.mubr.msk.f32.mxu0 %vm3038_vm2, %v3039_v22 }
0x1239   :  { %2805 = vmatprep.subr.bf16.mxu0 %v3037_v21 }
0x123c   :  { %2807 = vmatpush3.bf16.msra.mxu0 %v3210_v1 }
0x123d   :  { %2808 = vmatprep.subr.bf16.mxu0 %v3037_v21 }
0x130a   :  { %v1537_v0 = vpop.f32.mrb[10].mxu0 }
0x130b   :  { %v1538_v8 = vadd.f32 %v3440_v17, %v1537_v0  ;;  %v2597_v10 = vpop.f32.mrb[11].mxu0 }
0x130d   :  { %v1541_v11 = vmax.f32 %v1538_v8, 0.0 }
0x130f   :  { %2615 = vmatmul.mubr.msk.f32.vlgmr.msra.gmra.mrb[18].mxu1 %vm910_vm13, %v1541_v11 }
0x1310   :  { %2818 = vmatpush3.bf16.msra.mxu1 %v3259_v48  ;;  %2647 = vmatprep.mubr.msk.f32.mxu1 %vm3038_vm2, %v3039_v22 }
0x1311   :  { %2819 = vmatprep.subr.bf16.mxu1 %v3037_v21 }
0x1314   :  { %2821 = vmatpush3.bf16.msra.mxu1 %v3304_v30 }
0x1315   :  { %2822 = vmatprep.subr.bf16.mxu1 %v3037_v21 }
0x13e2   :  { %v1611_v6 = vpop.f32.mrb[18].mxu1 }
0x13e3   :  { %v1612_v1 = vadd.f32 %v1611_v6, %v3452_v25  ;;  %v2616_v13 = vpop.f32.mrb[19].mxu1 }
0x13e5   :  { %1616 = vrot.lane.b32.xlu1 %v1612_v1, %s3042_s7 }
0x1457   :  { %v1617_v15 = vpop.permute.xlu1 %1616 }
0x1458   :  { %v3549_v19 = vadd.f32 %v1617_v15, %v1441_v41 }
0x145a   :  { %1621 = vrot.lane.b32.xlu1 %v3549_v19, %s3040_s28  ;;  %v1628_v48 = vmul.f32 %v3549_v19, %v3549_v19 }
0x145c   :  { %1630 = vrot.lane.b32.xlu0 %v1628_v48, %s3040_s28 }
0x14cc   :  { %v1622_v30 = vpop.permute.xlu1 %1621 }
0x14cd   :  { %v1624_v20 = vsel %vm295_vm1, %v1622_v30, 0.0 }
0x14ce   :  { %1625 = vadd.xlane.f32.xlu1 %v1624_v20  ;;  %v1631_v23 = vpop.permute.xlu0 %1630 }
0x14cf   :  { %v1633_v9 = vsel %vm295_vm1, %v1631_v23, 0.0 }
0x14d0   :  { %1634 = vadd.xlane.f32.xlu0 %v1633_v9 }
0x155b   :  { %v1626_v18 = vpop.xlane.xlu1 %1625 }
0x155c   :  { %v1627_v27 = vmul.f32 0.03125, %v1626_v18 }
0x155d   :  { %v1635_v29 = vpop.xlane.xlu0 %1634 }
0x155e   :  { %v1637_v33 = vmul.f32 %v1627_v27, %v1627_v27  ;;  %v1636_v34 = vmul.f32 0.03125, %v1635_v29  ;;  %v1640_v38 = vsub.f32 %v3549_v19, %v1627_v27 }
0x1560   :  { %v1638_v37 = vsub.f32 %v1636_v34, %v1637_v33 }
0x1562   :  { %v1639_v32 = vmax.f32 %v1638_v37, 0.0 }
0x1564   :  { %v1641_v40 = vadd.f32 1e-05, %v1639_v32 }
0x1566   :  { %2920 = vrsqrt.f32 %v1641_v40 }
0x1570   :  { %v2921_v41 = vpop.eup %2920 }
0x1571   :  { %v1643_v46 = vmul.f32 %v2921_v41, %v1640_v38 }
0x1573   :  { %1645 = vrot.lane.b32.xlu0 %v1643_v46, %s3040_s28 }
0x15e5   :  { %v1646_v49 = vpop.permute.xlu0 %1645 }
0x15e6   :  { %2626 = vmatmul.mubr.msk.f32.vlgmr.msra.gmra.mrb[12].mxu0 %vm295_vm1, %v1646_v49 }
0x15e7   :  { %2811 = vmatpush3.bf16.xpose.msk.msra.mxu0 %vm3230_vm3, %v3234_v31  ;;  %2636 = vmatprep.mubr.msk.f32.mxu0 %vm3038_vm2, %v3039_v22 }
0x15e8   :  { %2812 = vmatprep.subr.bf16.mxu0 %v3037_v21 }
0x15ef   :  { %2815 = vmatpush3.bf16.xpose.msk.msra.mxu0 %vm3230_vm3, %v3244_v39 }
0x15f0   :  { %2828 = vmatprep.subr.bf16.mxu0 %v3037_v21 }
0x16b9   :  { %v1715_v26 = vpop.f32.mrb[12].mxu0 }
0x16ba   :  { %v1716_v51 = vadd.f32 %v1715_v26, %v3252_v43  ;;  %v2627_v52 = vpop.f32.mrb[13].mxu0 }
0x16bc   :  { %2637 = vmatmul.mubr.msk.f32.vlgmr.msra.gmra.mrb[14].mxu0 %vm295_vm1, %v1716_v51 }
0x16bd   :  { %2830 = vmatpush3.bf16.msra.mxu0 %v3287_v7  ;;  %2669 = vmatprep.mubr.msk.f32.mxu0 %vm3038_vm2, %v3039_v22 }
0x16be   :  { %2831 = vmatprep.subr.bf16.mxu0 %v3037_v21 }
0x16c1   :  { %2833 = vmatpush3.bf16.msra.mxu0 %v3294_v24 }
0x16c2   :  { %2840 = vmatprep.subr.bf16.mxu0 %v3037_v21 }
0x16c4   :  { %2670 = vmatmul.mubr.msk.f32.vlgmr.msra.gmra.mrb[16].mxu0 %vm295_vm1, %v1622_v30 }
0x16c5   :  { %2842 = vmatpush3.bf16.msra.mxu0 %v3397_v62  ;;  %2699 = vmatprep.mubr.msk.f32.mxu0 %vm3038_vm2, %v3039_v22 }
0x16c6   :  { %2843 = vmatprep.subr.bf16.mxu0 %v3037_v21 }
0x16c9   :  { %2845 = vmatpush3.bf16.msra.mxu0 %v3403_v63 }
0x16ca   :  { %2846 = vmatprep.subr.bf16.mxu0 %v3037_v21 }
0x16cd   :  { %2848 = vmatpush3.bf16.msra.mxu0 %v3413_v4 }
0x16ce   :  { %2849 = vmatprep.subr.bf16.mxu0 %v3037_v21 }
0x16d1   :  { %2851 = vmatpush3.bf16.msra.mxu0 %v3433_v16 }
0x178f   :  { %v1788_v28 = vpop.f32.mrb[14].mxu0 }
0x1790   :  { %v1792_v31 = vsel %vm3265_vm12, %v1788_v28, -1e+30  ;;  %v2638_v39 = vpop.f32.mrb[15].mxu0 }
0x1791   :  { %v1793_v43 = vsel %vm295_vm1, %v1792_v31, -inf }
0x1792   :  { %v1794_v7 = vrot.slane %v1793_v43, 4 }
0x1794   :  { %v1795_v24 = vmax.f32 %v1793_v43, %v1794_v7 }
0x1796   :  { %v1796_v62 = vrot.slane %v1795_v24, 2 }
0x1797   :  { %v2033_v53 = vpop.f32.mrb[16].mxu0 }
0x1798   :  { %v1797_v63 = vmax.f32 %v1795_v24, %v1796_v62  ;;  %v2671_v54 = vpop.f32.mrb[17].mxu0  ;;  %v2053_v1 = vadd.f32 %v2033_v53, %v3331_v44 }
0x179a   :  { %v1798_v55 = vrot.slane %v1797_v63, 1 }
0x179c   :  { %v1799_v56 = vmax.f32 %v1797_v63, %v1798_v55 }
0x179e   :  { %v1800_v4 = vsub.f32 %v1792_v31, %v1799_v56 }
0x17a0   :  { %v1801_v35 = vmul.f32 1.442695, %v1800_v4 }
0x17a2   :  { %2922 = vpow2.f32 %v1801_v35 }
0x17ac   :  { %v2923_v58 = vpop.eup %2922 }
0x17ad   :  { %v1803_v16 = vsel %vm295_vm1, %v2923_v58, 0.0 }
0x17ae   :  { %v1804_v59 = vrot.slane %v1803_v16, 4 }
0x17b0   :  { %v1805_v60 = vadd.f32 %v1804_v59, %v1803_v16 }
0x17b2   :  { %v1806_v61 = vrot.slane %v1805_v60, 2 }
0x17b4   :  { %v1807_v14 = vadd.f32 %v1806_v61, %v1805_v60 }
0x17b6   :  { %v1808_v2 = vrot.slane %v1807_v14, 1 }
0x17b8   :  { %v1809_v3 = vadd.f32 %v1808_v2, %v1807_v14 }
0x17ba   :  { %2924 = vrcp.f32 %v1809_v3 }
0x17c4   :  { %v2925_v0 = vpop.eup %2924 }
0x17c5   :  { %v1811_v8 = vmul.f32 %v2925_v0, %v2923_v58 }
0x17c7   :  { %v1812_v10 = vadd.f32 1e-06, %v1811_v8 }
0x17c9   :  { %v1813_v11 = vsel %vm3265_vm12, %v1812_v10, 0.0 }
0x17ca   :  { %v1814_v6 = vsel %vm295_vm1, %v1813_v11, 0.0 }
0x17cb   :  { %1815 = vadd.xlane.f32.xlu1 %v1814_v6 }
0x17dc   :  { %2055 = vrot.lane.b32.xlu1 %v2053_v1, %s3041_s15 }
0x1858   :  { %v1816_v13 = vpop.xlane.xlu1 %1815 }
0x1859   :  { %2926 = vrcp.f32 %v1816_v13 }
0x185c   :  { %v2056_v29 = vpop.permute.xlu1 %2055 }
0x1863   :  { %v2927_v15 = vpop.eup %2926 }
0x1864   :  { %v1818_v48 = vmul.f32 %v2927_v15, %v1813_v11 }
0x1866   :  { %2648 = vmatmul.mubr.msk.f32.vlgmr.msra.gmra.mrb[20].mxu1 %vm295_vm1, %v1818_v48 }
0x1867   :  { %2824 = vmatpush3.bf16.msra.mxu1 %v3314_v36  ;;  %2658 = vmatprep.mubr.msk.f32.mxu1 %vm3038_vm2, %v3039_v22 }
0x1868   :  { %2825 = vmatprep.subr.bf16.mxu1 %v3037_v21 }
0x186b   :  { %2827 = vmatpush3.bf16.msra.mxu1 %v3324_v42 }
0x186c   :  { %2834 = vmatprep.subr.bf16.mxu1 %v3037_v21 }
0x1939   :  { %v1888_v50 = vpop.f32.mrb[20].mxu1 }
0x193a   :  { %v2649_v44 = vpop.f32.mrb[21].mxu1  ;;  %2659 = vmatmul.mubr.msk.f32.vlgmr.msra.gmra.mrb[22].mxu1 %vm295_vm1, %v1888_v50 }
0x193b   :  { %2836 = vmatpush3.bf16.msra.mxu1 %v3377_v45  ;;  %2680 = vmatprep.mubr.msk.f32.mxu1 %vm3038_vm2, %v3039_v22 }
0x193c   :  { %2837 = vmatprep.subr.bf16.mxu1 %v3037_v21 }
0x193f   :  { %2839 = vmatpush3.bf16.msra.mxu1 %v3383_v47 }
0x1a0d   :  { %v1961_v36 = vpop.f32.mrb[22].mxu1 }
0x1a0e   :  { %v2037_v30 = vadd.f32 %v2033_v53, %v1961_v36  ;;  %v2660_v20 = vpop.f32.mrb[23].mxu1  ;;  %v2052_v22 = vadd.f32 %v1961_v36, %v3352_v5 }
0x1a10   :  { %v2038_v42 = vadd.f32 %v2037_v30, %v3348_v57  ;;  %v2045_v57 = vadd.f32 %v2037_v30, %v3356_v12 }
0x1a12   :  { %v2313_v23 = vmul.f32 -1.442695, %v2038_v42  ;;  %v2314_v34 = vmul.f32 -1.442695, %v2045_v57 }
0x1a14   :  { %2928 = vpow2.f32 %v2313_v23 }
0x1a1e   :  { %v2929_v9 = vpop.eup %2928 }
0x1a1f   :  { %v2042_v18 = vadd.f32 1.0, %v2929_v9 }
0x1a21   :  { %2930 = vrcp.f32 %v2042_v18 }
0x1a2b   :  { %v2931_v27 = vpop.eup %2930 }
0x1a2c   :  { %v2058_v45 = vmul.f32 %v2931_v27, %v2056_v29 }
0x1a2e   :  { %2060 = vrot.lane.b32.xlu0 %v2058_v45, %s3041_s15  ;;  %s3006_s15 = scalar_lea.vmem %s2263_s10, 128 }
0x1a2f   :  { %p3007_p10 = scmp.ne.s32.totalorder %s2263_s10, %s3006_s15  ;;  %p3012_p12 = scmp.lt.s32.totalorder %s3006_s15, %s3006_s15 }
0x1a31   :  { %p3013_p13 = por %p3012_p12, %p3011_p11 }
0x1a33   :  { %p3014_p0 = pnand %p3013_p13, %p3007_p10 }
0x1aa0   :  { %v2061_v21 = vpop.permute.xlu0 %2060 }
0x1aa1   :  { %v2063_v33 = vadd.f32 %v2061_v21, %v2052_v22 }
0x1aa3   :  { %2932 = vtanh.f32 %v2063_v33 }
0x1aa4   :  { %2934 = vpow2.f32 %v2314_v34 }
0x1aad   :  { %v2933_v47 = vpop.eup %2932 }
0x1aae   :  { %2067 = vrot.lane.b32.xlu1 %v2933_v47, %s3040_s28  ;;  %v2935_v37 = vpop.eup %2934 }
0x1aaf   :  { %v2049_v32 = vadd.f32 1.0, %v2935_v37 }
0x1ab1   :  { %2936 = vrcp.f32 %v2049_v32 }
0x1abb   :  { %v2937_v40 = vpop.eup %2936 }
0x1abc   :  { %v2065_v38 = vsub.f32 1.0, %v2937_v40  ;;  %v2071_v46 = vmul.f32 %v2937_v40, %v3549_v19 }
0x1b20   :  { %v2068_v41 = vpop.permute.xlu1 %2067 }
0x1b21   :  { %v2070_v49 = vmul.f32 %v2068_v41, %v2065_v38 }
0x1b23   :  { %v2072_v5 = vadd.f32 %v2071_v46, %v2070_v49 }
0x1b25   :  { %2074 = vrot.lane.b32.xlu0 %v2072_v5, %s3040_s28  ;;  %v2081_v26 = vmul.f32 %v2072_v5, %v2072_v5 }
0x1b27   :  { %2083 = vrot.lane.b32.xlu1 %v2081_v26, %s3040_s28 }
0x1b97   :  { %v2075_v51 = vpop.permute.xlu0 %2074 }
0x1b98   :  { %v2077_v12 = vsel %vm295_vm1, %v2075_v51, 0.0 }
0x1b99   :  { %2078 = vadd.xlane.f32.xlu0 %v2077_v12  ;;  %v2084_v52 = vpop.permute.xlu1 %2083 }
0x1b9a   :  { %v2086_v28 = vsel %vm295_vm1, %v2084_v52, 0.0 }
0x1b9b   :  { %2087 = vadd.xlane.f32.xlu1 %v2086_v28 }
0x1c26   :  { %v2079_v31 = vpop.xlane.xlu0 %2078 }
0x1c27   :  { %v2080_v39 = vmul.f32 0.03125, %v2079_v31 }
0x1c28   :  { %v2088_v43 = vpop.xlane.xlu1 %2087 }
0x1c29   :  { %v2090_v7 = vmul.f32 %v2080_v39, %v2080_v39  ;;  %v2089_v19 = vmul.f32 0.03125, %v2088_v43  ;;  %v2093_v63 = vsub.f32 %v2072_v5, %v2080_v39 }
0x1c2b   :  { %v2091_v24 = vsub.f32 %v2089_v19, %v2090_v7 }
0x1c2d   :  { %v2092_v62 = vmax.f32 %v2091_v24, 0.0 }
0x1c2f   :  { %v2094_v53 = vadd.f32 1e-05, %v2092_v62 }
0x1c31   :  { %2938 = vrsqrt.f32 %v2094_v53 }
0x1c3b   :  { %v2939_v54 = vpop.eup %2938 }
0x1c3c   :  { %v2096_v55 = vmul.f32 %v2939_v54, %v2093_v63 }
0x1c3e   :  { %2098 = vrot.lane.b32.xlu0 %v2096_v55, %s3040_s28 }
0x1cb0   :  { %v2099_v56 = vpop.permute.xlu0 %2098 }
0x1cb1   :  { %2681 = vmatmul.mubr.msk.f32.vlgmr.msra.gmra.mrb[24].mxu1 %vm295_vm1, %v2099_v56 }
0x1d84   :  { %v2168_v4 = vpop.f32.mrb[24].mxu1 }
0x1d85   :  { %v2169_v35 = vadd.f32 %v3440_v17, %v2168_v4  ;;  %v2682_v58 = vpop.f32.mrb[25].mxu1 }
0x1d87   :  { %v2172_v16 = vmax.f32 %v2169_v35, 0.0 }
0x1d89   :  { %2700 = vmatmul.mubr.msk.f32.vlgmr.msra.gmra.mrb[18].mxu0 %vm910_vm13, %v2172_v16 }
0x1e5c   :  { %v2242_v59 = vpop.f32.mrb[18].mxu0 }
0x1e5d   :  { %v2243_v60 = vadd.f32 %v2242_v59, %v3452_v25  ;;  %v2701_v61 = vpop.f32.mrb[19].mxu0 }
0x1e5f   :  { %2247 = vrot.lane.b32.xlu1 %v2243_v60, %s3042_s7 }
0x1ed1   :  { %v2248_v14 = vpop.permute.xlu1 %2247 }
0x1ed2   :  { %v2250_v2 = vadd.f32 %v2248_v14, %v2072_v5 }
0x1ed4   :  { %2252 = vrot.lane.b32.xlu0 %v2250_v2, %s3040_s28 }
0x1f46   :  { %v2253_v3 = vpop.permute.xlu0 %2252 }
0x1f47   :  { %2255 = vst.msk [vmem:[#allocation8] sm:$0xff] %vm295_vm1, %v2253_v3 }
0x1f48   :  { %3017 = shalt.err (!%p3014_p0)
}
0x1f49   :  { %s3018_s7 = scalar_lea.hbm %s3652_s11, 128 }
0x1f4a   :  { %p3019_p1 = scmp.ne.s32.totalorder %s3652_s11, %s3018_s7  ;;  %p3022_p2 = scmp.lt.u32.totalorder %s3018_s7, %s3652_s11 }
0x1f4c   :  { %p3024_p3 = pnand %p3022_p2, %p3019_p1 }
0x1f4e   :  { %3027 = shalt.err (!%p3024_p3)
}
0x1f4f   :  { %2265 = dma.vmem_to_hbm [thread:$0]  %s2263_s10, 128, %s3652_s11, [#allocation4]  }
0x1f50   :  { %3032 = dma.done.wait [#allocation4], 128  }
0x1f51   :  { %3033 = vsyncadd [#allocation4], 4294967168 }
0x1f52   :  { %2269 = vsyncpa [#allocation3], 1 }
0x1f53   :  { %2270 = vsyncpa [#allocation6], 1 }
0x1f54   :  { %2271 = vsyncpa [#allocation4], 1 }

</bundles_post_ra>
